<compile_context>
chip_gen: v7x
topology: tpu7x:2x2x1
jax: 0.10.0
libtpu: 0.0.40
codegen_flags: <defaults>
</compile_context>

<pallas_src>
import jax
import jax.numpy as jnp
from jax.experimental import pallas as pl
from jax.experimental.pallas import tpu as pltpu


def _round_up(x, m):
    return ((x + m - 1) // m) * m


def _vmem_capacity_bytes():
    try:
        return int(pltpu.get_tpu_info().vmem_capacity_bytes)
    except Exception:
        return 64 * 1024 * 1024  # conservative fallback (v7x per-TC VMEM)


def _pick_h_tile(H, max_th):
    """Largest th <= max_th dividing H; prefer multiples of 256 (v6e/v7x MXU
    width), fall back to 128.  If nothing divides, return (th, padded H)."""
    max_th = max(128, min(max_th, H))
    for step in (256, 128):
        t = (max_th // step) * step
        while t >= step:
            if H % t == 0:
                return t, H
            t -= step
    t = max(128, (max_th // 128) * 128)
    return t, _round_up(H, t)


def _pick_tiles(M, C, H, vmem_cap):
    """Choose (tm, th, Hp) from the VMEM budget.

    Per-M-row VMEM: double-buffered bf16 input block + f32 output block.
    Per-H-col VMEM: double-buffered bf16 Wk column tile + Wv row tile.
    """
    budget = int(vmem_cap * 0.70)            # headroom for compiler scratch
    row_bytes = 2 * C * 2 + 2 * C * 4        # k_in (bf16) + out (f32), x2 buffers
    col_bytes = 2 * C * 2 + 2 * C * 2        # Wk col + Wv row (bf16), x2 buffers
    min_tm = min(_round_up(M, 16), 256)

    if H * col_bytes + min_tm * row_bytes <= budget:
        # Weights fully VMEM-resident: H grid axis collapses to one step, so the
        # weights are DMA'd from HBM exactly once (index map invariant).
        th, Hp = H, H
        tm = (budget - H * col_bytes) // row_bytes
    else:
        # Weights streamed per M tile: raise tm to amortize the weight re-fetch,
        # then pick the largest th that still fits (prefer 256-multiples).
        tm = 512
        th_budget = max(128, (budget - tm * row_bytes) // col_bytes)
        th, Hp = _pick_h_tile(H, th_budget)
        tm = (budget - th * col_bytes) // row_bytes

    tm = max(16, min(tm, 1024, _round_up(M, 16)))
    tm = (tm // 128) * 128 if tm >= 128 else max(16, (tm // 16) * 16)
    return tm, th, Hp


def cmix_kernel(kin_ref, wk_ref, wv_ref, o_ref):
    # kin_ref : [tm, C]  bf16  time-shift-mixed activations (B*T rows fused)
    # wk_ref  : [C, th]  bf16  key-weight column tile
    # wv_ref  : [th, C]  bf16  value-weight row tile
    # o_ref   : [tm, C]  f32   output rows; VMEM-resident across the h axis,
    #                          used directly as the accumulator.
    h = pl.program_id(1)

    s = jnp.dot(kin_ref[...], wk_ref[...], preferred_element_type=jnp.float32)
    s = jnp.maximum(s, 0.0)
    s = s * s
    part = jnp.dot(s.astype(jnp.bfloat16), wv_ref[...],
                   preferred_element_type=jnp.float32)

    @pl.when(h == 0)
    def _():
        o_ref[...] = part

    @pl.when(h > 0)
    def _():
        o_ref[...] += part


def rwkv_cmix_forward(x, x_k, wk_t, wv_t, *, tm=None, th=None):
    """Transformer-mode forward.

    x    : [B, T, C] float32
    x_k  : [1, 1, C] float32
    wk_t : [C, 4C]   (key.weight transposed)
    wv_t : [4C, C]   (value.weight transposed)
    """
    B, T, C = x.shape
    H = wk_t.shape[1]
    assert wk_t.shape == (C, H) and wv_t.shape == (H, C)

    # --- time shift + x_k mix: mem-bound elementwise pre-pass (XLA fuses) -----
    x_prev = jnp.pad(x, ((0, 0), (1, 0), (0, 0)))[:, :-1, :]
    k_in = (x + (x_prev - x) * x_k).reshape(B * T, C).astype(jnp.bfloat16)
    # TODO(synk): fuse the time-shift mix into the kernel (needs a one-row halo
    # or T % tm == 0 first-row masking) to drop the [M, C] HBM round-trip.

    # --- generation-aware tiling ----------------------------------------------
    M = B * T
    vmem_cap = _vmem_capacity_bytes()
    auto_tm, auto_th, Hp = _pick_tiles(M, C, H, vmem_cap)
    if tm is None:
        tm = auto_tm
    else:
        tm = max(16, min(_round_up(tm, 16), _round_up(M, 16)))
    if th is None:
        th = auto_th
    else:
        th = max(128, _round_up(th, 128))
        Hp = _round_up(H, th)

    Mp = _round_up(M, tm)
    if Mp != M:
        # zero rows are exact: relu(0 @ Wk)**2 @ Wv == 0 (discarded on return)
        k_in = jnp.pad(k_in, ((0, Mp - M), (0, 0)))

    wk_bf = wk_t.astype(jnp.bfloat16)
    wv_bf = wv_t.astype(jnp.bfloat16)
    if Hp != H:
        # zero-padded hidden columns contribute exactly zero
        wk_bf = jnp.pad(wk_bf, ((0, 0), (0, Hp - H)))
        wv_bf = jnp.pad(wv_bf, ((0, Hp - H), (0, 0)))

    n_m, n_h = Mp // tm, Hp // th
    weight_bytes = 4 * C * Hp * (1 if n_h == 1 else n_m)
    cost = pl.CostEstimate(
        flops=4 * Mp * C * Hp,
        transcendentals=0,
        bytes_accessed=Mp * C * 2 + weight_bytes + Mp * C * 4,
    )

    out = pl.pallas_call(
        cmix_kernel,
        out_shape=jax.ShapeDtypeStruct((Mp, C), jnp.float32),
        grid_spec=pltpu.PrefetchScalarGridSpec(
            num_scalar_prefetch=0,
            grid=(n_m, n_h),
            in_specs=[
                pl.BlockSpec((tm, C), lambda m, h: (m, 0)),   # activations
                pl.BlockSpec((C, th), lambda m, h: (0, h)),   # Wk column tile
                pl.BlockSpec((th, C), lambda m, h: (h, 0)),   # Wv row tile
            ],
            out_specs=pl.BlockSpec((tm, C), lambda m, h: (m, 0)),
        ),
        compiler_params=pltpu.CompilerParams(
            dimension_semantics=("parallel", "arbitrary"),
            vmem_limit_bytes=int(vmem_cap * 0.9),
        ),
        cost_estimate=cost,
    )(k_in, wk_bf, wv_bf)

    return out[:M].reshape(B, T, C).astype(x.dtype)


def make_params(n_embd, n_layer, layer_id, key):
    """Deterministic parameter init matching the module's shapes."""
    ratio_1_to_almost0 = 1.0 - layer_id / n_layer
    ddd = jnp.arange(n_embd, dtype=jnp.float32) / n_embd          # ddd[0,0,i] = i/n_embd
    x_k = (1.0 - jnp.power(ddd, ratio_1_to_almost0 ** 4)).reshape(1, 1, n_embd)

    k1, k2 = jax.random.split(key)
    # nn.Linear(n_embd, 4*n_embd).weight is [4C, C]; store transposed [C, 4C]
    wk = jax.random.normal(k1, (4 * n_embd, n_embd), jnp.float32) * (1.0 / jnp.sqrt(n_embd))
    # nn.Linear(4*n_embd, n_embd).weight is [C, 4C]; store transposed [4C, C]
    wv = jax.random.normal(k2, (n_embd, 4 * n_embd), jnp.float32) * (1.0 / jnp.sqrt(4 * n_embd))
    return x_k, wk.T, wv.T


def reference_forward_f32(x, x_k, wk_t, wv_t):
    """Pure-JAX f32 reference of the PyTorch _forward_transformer."""
    x_prev = jnp.pad(x, ((0, 0), (1, 0), (0, 0)))[:, :-1, :]
    k = x + (x_prev - x) * x_k
    k = jnp.maximum(k @ wk_t, 0.0) ** 2
    return k @ wv_t


def reference_forward_bf16(x, x_k, wk_t, wv_t):
    """Reference with the same bf16 operand casts the kernel uses."""
    x_prev = jnp.pad(x, ((0, 0), (1, 0), (0, 0)))[:, :-1, :]
    k = (x + (x_prev - x) * x_k).astype(jnp.bfloat16)
    h = jnp.dot(k, wk_t.astype(jnp.bfloat16), preferred_element_type=jnp.float32)
    h = jnp.maximum(h, 0.0) ** 2
    return jnp.dot(h.astype(jnp.bfloat16), wv_t.astype(jnp.bfloat16),
                   preferred_element_type=jnp.float32)


if __name__ == "__main__":
    # Small but aligned shapes (C >= 128 so lane dim is dense).
    B, T, C = 2, 256, 128
    n_layer, layer_id = 4, 1

    key = jax.random.PRNGKey(0)
    kx, kp = jax.random.split(key)
    x = jax.random.normal(kx, (B, T, C), jnp.float32)
    x_k, wk_t, wv_t = make_params(C, n_layer, layer_id, kp)

    ref_bf16 = reference_forward_bf16(x, x_k, wk_t, wv_t)
    ref_f32 = reference_forward_f32(x, x_k, wk_t, wv_t)

    # 1) Auto-tiled path: at this size the weights are fully VMEM-resident
    #    (single H step, weights DMA'd once).
    out = jax.block_until_ready(rwkv_cmix_forward(x, x_k, wk_t, wv_t))
    assert out.shape == (B, T, C)
    assert jnp.allclose(out, ref_bf16, atol=2e-2, rtol=2e-2)
    assert jnp.allclose(out, ref_f32, atol=2e-1, rtol=5e-2)

    # 2) Forced small tiles: exercises the H-tiled accumulate-into-output path
    #    and M-axis tiling (grid = (4, 2)).
    out2 = jax.block_until_ready(
        rwkv_cmix_forward(x, x_k, wk_t, wv_t, tm=128, th=256))
    assert jnp.allclose(out2, ref_bf16, atol=2e-2, rtol=2e-2)

    # TODO(synk): RNN single-step mode (_forward_rnn) shares the same math with
    # x_prev supplied from external state; not wired into a separate kernel here.
    print("KERNEL_OK")
</pallas_src>

<mosaic_0001>
module attributes {stable_mosaic.version = 11 : i64} {
  func.func @cmix_kernel(%arg0: i32, %arg1: i32, %arg2: memref<512x128xbf16, #tpu.memory_space<vmem>>, %arg3: memref<128x512xbf16, #tpu.memory_space<vmem>>, %arg4: memref<512x128xbf16, #tpu.memory_space<vmem>>, %arg5: memref<512x128xf32, #tpu.memory_space<vmem>>) attributes {dimension_semantics = [#tpu.dimension_semantics<parallel>, #tpu.dimension_semantics<arbitrary>], iteration_bounds = array<i64: 1, 1>, scalar_prefetch = 0 : i64, scratch_operands = 0 : i64, tpu.core_type = #tpu.core_type<tc>, window_params = [{transform_indices = @transform_0, window_bounds = array<i64: 512, 128>}, {transform_indices = @transform_1, window_bounds = array<i64: 128, 512>}, {transform_indices = @transform_2, window_bounds = array<i64: 512, 128>}, {transform_indices = @transform_3, window_bounds = array<i64: 512, 128>}]} {
    %c0 = arith.constant 0 : index
    %c0_0 = arith.constant 0 : index
    %0 = vector.load %arg2[%c0, %c0_0] : memref<512x128xbf16, #tpu.memory_space<vmem>>, vector<512x128xbf16>
    %c0_1 = arith.constant 0 : index
    %c0_2 = arith.constant 0 : index
    %1 = vector.load %arg3[%c0_1, %c0_2] : memref<128x512xbf16, #tpu.memory_space<vmem>>, vector<128x512xbf16>
    %cst = arith.constant dense<0.000000e+00> : vector<512x512xf32>
    %2 = tpu.matmul %0, %1, %cst {dimension_numbers = #tpu.dot_dimension_numbers<[1], [0], [0], [1], [0, 0, 1, 1], [], []>} : vector<512x128xbf16>, vector<128x512xbf16>, vector<512x512xf32> -> vector<512x512xf32>
    %cst_3 = arith.constant 0.000000e+00 : f32
    %3 = vector.broadcast %cst_3 : f32 to vector<512x512xf32>
    %4 = arith.maximumf %2, %3 : vector<512x512xf32>
    %5 = arith.mulf %4, %4 : vector<512x512xf32>
    %6 = arith.truncf %5 : vector<512x512xf32> to vector<512x512xbf16>
    %c0_4 = arith.constant 0 : index
    %c0_5 = arith.constant 0 : index
    %7 = vector.load %arg4[%c0_4, %c0_5] : memref<512x128xbf16, #tpu.memory_space<vmem>>, vector<512x128xbf16>
    %cst_6 = arith.constant dense<0.000000e+00> : vector<512x128xf32>
    %8 = tpu.matmul %6, %7, %cst_6 {dimension_numbers = #tpu.dot_dimension_numbers<[1], [0], [0], [1], [0, 0, 1, 1], [], []>} : vector<512x512xbf16>, vector<512x128xbf16>, vector<512x128xf32> -> vector<512x128xf32>
    %c0_i32 = arith.constant 0 : i32
    %9 = arith.cmpi eq, %arg1, %c0_i32 : i32
    %10 = arith.extui %9 : i1 to i32
    %c0_i32_7 = arith.constant 0 : i32
    %11 = arith.cmpi ne, %10, %c0_i32_7 : i32
    scf.if %11 {
      %c0_10 = arith.constant 0 : index
      %c0_11 = arith.constant 0 : index
      %15 = vector.load %arg5[%c0_10, %c0_11] : memref<512x128xf32, #tpu.memory_space<vmem>>, vector<512x128xf32>
      tpu.vector_store %arg5[%c0_10, %c0_11], %8 {strides = array<i32>} : memref<512x128xf32, #tpu.memory_space<vmem>>, vector<512x128xf32>,
    } else {
    }
    %c0_i32_8 = arith.constant 0 : i32
    %12 = arith.cmpi sgt, %arg1, %c0_i32_8 : i32
    %13 = arith.extui %12 : i1 to i32
    %c0_i32_9 = arith.constant 0 : i32
    %14 = arith.cmpi ne, %13, %c0_i32_9 : i32
    scf.if %14 {
      %c0_10 = arith.constant 0 : index
      %c0_11 = arith.constant 0 : index
      %15 = vector.load %arg5[%c0_10, %c0_11] : memref<512x128xf32, #tpu.memory_space<vmem>>, vector<512x128xf32>
      %16 = arith.addf %15, %8 : vector<512x128xf32>
      %c0_12 = arith.constant 0 : index
      %c0_13 = arith.constant 0 : index
      %17 = vector.load %arg5[%c0_12, %c0_13] : memref<512x128xf32, #tpu.memory_space<vmem>>, vector<512x128xf32>
      tpu.vector_store %arg5[%c0_12, %c0_13], %16 {strides = array<i32>} : memref<512x128xf32, #tpu.memory_space<vmem>>, vector<512x128xf32>,
    } else {
    }
    return
  }
  func.func @transform_0(%arg0: i32, %arg1: i32) -> (i32, i32) {
    %c0_i32 = arith.constant 0 : i32
    %c0_i32_0 = arith.constant 0 : i32
    return %arg0, %c0_i32 : i32, i32
  }
  func.func @transform_1(%arg0: i32, %arg1: i32) -> (i32, i32) {
    %c0_i32 = arith.constant 0 : i32
    %c0_i32_0 = arith.constant 0 : i32
    return %c0_i32, %arg1 : i32, i32
  }
  func.func @transform_2(%arg0: i32, %arg1: i32) -> (i32, i32) {
    %c0_i32 = arith.constant 0 : i32
    %c0_i32_0 = arith.constant 0 : i32
    return %arg1, %c0_i32 : i32, i32
  }
  func.func @transform_3(%arg0: i32, %arg1: i32) -> (i32, i32) {
    %c0_i32 = arith.constant 0 : i32
    %c0_i32_0 = arith.constant 0 : i32
    return %arg0, %c0_i32 : i32, i32
  }
}

</mosaic_0001>

<bundles_post_ra>
// kernel: tpu_custom_call.1
= control target key start
LH: loop header
LB: loop body
LE: loop exit
PB: predicated region body
PF: predicated region fallthrough
CT: control target
= control target key end

     0   :  { %8 = vsyncpa [#allocation3], 0  ;;  %s4671_s0 = inlined_call_operand.hbm [shape: bf16[512,128], index: 0, kind: input, shape index: {}]   ;;  %s4672_s1 = inlined_call_operand.hbm [shape: bf16[128,512], index: 1, kind: input, shape index: {}]   ;;  %s4673_s2 = inlined_call_operand.hbm [shape: bf16[512,128], index: 2, kind: input, shape index: {}]   ;;  %s4674_s3 = inlined_call_operand.hbm [shape: f32[512,128], index: 3, kind: output, shape index: {}]  }
   0x1   :  { %9 = vsyncpa [#allocation6], 0 }
   0x2   :  { %10 = vsyncpa [#allocation4], 0  ;;  %s3344_s12 = smov [#allocation5]   ;;  %s3250_s16 = scalar_lea.hbm %s4672_s1, 4096 }
   0x3   :  { %s28_s13 = sshll.u32 %s3344_s12, 4  ;;  %p3251_p0 = scmp.ne.s32.totalorder %s4672_s1, %s3250_s16  ;;  %s29_s13 = int_to_ptr.vmem [resolvable:$true] %s28_s13 }
   0x4   :  { %p3254_p1 = scmp.lt.u32.totalorder %s3250_s16, %s4672_s1 }
   0x6   :  { %p3256_p2 = pnand %p3254_p1, %p3251_p0 }
   0x8   :  { %3259 = shalt.err (!%p3256_p2)
}
   0x9   :  { %s3260_s21 = scalar_lea.vmem %s29_s13, 4096  ;;  %p3265_p4 = scmp.lt.s32.totalorder %s29_s13, %s29_s13 }
   0xa   :  { %p3261_p3 = scmp.ne.s32.totalorder %s29_s13, %s3260_s21  ;;  %p3266_p5 = scmp.lt.s32.totalorder %s3260_s21, %s3260_s21 }
   0xc   :  { %p3267_p6 = por %p3266_p5, %p3265_p4 }
   0xe   :  { %p3268_p7 = pnand %p3267_p6, %p3261_p3 }
  0x10   :  { %3271 = shalt.err (!%p3268_p7)
}
  0x11   :  { %s3345_s22 = smov 256   ;;  %s3346_s23 = smov 16  }
  0x12   :  { %34 = dma.hbm_to_vmem [thread:$0]  %s4672_s1, 4096, %s29_s13, [#allocation6], %s3345_s22, %s3345_s22, %s3346_s23  }
  0x13   :  { %s3347_s26 = smov [#allocation2]   ;;  %s3272_s30 = scalar_lea.hbm %s4671_s0, 4096 }
  0x14   :  { %s16_s27 = sshll.u32 %s3347_s26, 4  ;;  %p3273_p8 = scmp.ne.s32.totalorder %s4671_s0, %s3272_s30  ;;  %s17_s27 = int_to_ptr.vmem [resolvable:$true] %s16_s27 }
  0x15   :  { %p3276_p9 = scmp.lt.u32.totalorder %s3272_s30, %s4671_s0 }
  0x17   :  { %p3278_p10 = pnand %p3276_p9, %p3273_p8 }
  0x19   :  { %3281 = shalt.err (!%p3278_p10)
}
  0x1a   :  { %s3282_s8 = scalar_lea.vmem %s17_s27, 4096  ;;  %p3287_p12 = scmp.lt.s32.totalorder %s17_s27, %s17_s27 }
  0x1b   :  { %p3283_p11 = scmp.ne.s32.totalorder %s17_s27, %s3282_s8  ;;  %p3288_p13 = scmp.lt.s32.totalorder %s3282_s8, %s3282_s8 }
  0x1d   :  { %p3289_p0 = por %p3288_p13, %p3287_p12 }
  0x1f   :  { %p3290_p1 = pnand %p3289_p0, %p3283_p11 }
  0x21   :  { %3293 = shalt.err (!%p3290_p1)
}
  0x22   :  { %s3348_s1 = smov 64   ;;  %s3349_s9 = smov 4  }
  0x23   :  { %22 = dma.hbm_to_vmem [thread:$0]  %s4671_s0, 4096, %s17_s27, [#allocation3], %s3348_s1, %s3348_s1, %s3349_s9  }
  0x24   :  { %s3350_s12 = smov [#allocation7]   ;;  %s3294_s16 = scalar_lea.hbm %s4673_s2, 4096 }
  0x25   :  { %s40_s13 = sshll.u32 %s3350_s12, 4  ;;  %p3295_p2 = scmp.ne.s32.totalorder %s4673_s2, %s3294_s16  ;;  %s41_s13 = int_to_ptr.vmem [resolvable:$true] %s40_s13 }
  0x26   :  { %p3298_p3 = scmp.lt.u32.totalorder %s3294_s16, %s4673_s2 }
  0x28   :  { %p3300_p4 = pnand %p3298_p3, %p3295_p2 }
  0x2a   :  { %3303 = shalt.err (!%p3300_p4)
}
  0x2b   :  { %s3304_s21 = scalar_lea.vmem %s41_s13, 4096  ;;  %p3309_p6 = scmp.lt.s32.totalorder %s41_s13, %s41_s13 }
  0x2c   :  { %p3305_p5 = scmp.ne.s32.totalorder %s41_s13, %s3304_s21  ;;  %p3310_p7 = scmp.lt.s32.totalorder %s3304_s21, %s3304_s21 }
  0x2e   :  { %p3311_p8 = por %p3310_p7, %p3309_p6 }
  0x30   :  { %p3312_p9 = pnand %p3311_p8, %p3305_p5 }
  0x32   :  { %3315 = shalt.err (!%p3312_p9)
}
  0x33   :  { %46 = dma.hbm_to_vmem [thread:$0]  %s4673_s2, 4096, %s41_s13, [#allocation6], %s3348_s1, %s3348_s1, %s3349_s9  }
  0x34   :  { %3338 = dma.done.wait [#allocation3], 4096  }
  0x35   :  { %3339 = vsyncadd [#allocation3], 4294963200 }
  0x36   :  { %3340 = dma.done.wait [#allocation6], 8192  }
  0x37   :  { %3341 = vsyncadd [#allocation6], 4294959104  ;;  %v3351_v0 = vmov 0   ;;  %v3138_v1 = vld [vmem:[#allocation5 + $0x4] ss:$16 sps:$4 sm:$0xff]   ;;  %v3191_v36 = vld [vmem:[#allocation7 + $0x8] sm:$0xff]  }
  0x38   :  { %537 = vmatprep.mubr.bf16.mxu0 %v3351_v0  ;;  %890 = vmatprep.mubr.bf16.mxu1 %v3351_v0  ;;  %v3140_v2 = vld [vmem:[#allocation5 + $0xc] ss:$16 sps:$4 sm:$0xff]   ;;  %v3142_v3 = vld [vmem:[#allocation5] ss:$16 sps:$4 sm:$0xff]   ;;  %v3143_v4 = vld [vmem:[#allocation5 + $0x8] ss:$16 sps:$4 sm:$0xff]  }
  0x39   :  { %505 = vmatprep.subr.bf16.mxu0 %v3138_v1  ;;  %858 = vmatprep.subr.bf16.mxu1 %v3140_v2  ;;  %v3144_v5 = vld [vmem:[#allocation5 + $0x24] ss:$16 sps:$4 sm:$0xff]   ;;  %v3146_v6 = vld [vmem:[#allocation5 + $0x2c] ss:$16 sps:$4 sm:$0xff]   ;;  %v3148_v7 = vld [vmem:[#allocation5 + $0x20] ss:$16 sps:$4 sm:$0xff]  }
  0x3a   :  { %506 = vmatpush1.bf16.msra.mxu0 %v3142_v3  ;;  %859 = vmatpush1.bf16.msra.mxu1 %v3143_v4  ;;  %v3149_v8 = vld [vmem:[#allocation5 + $0x28] ss:$16 sps:$4 sm:$0xff]   ;;  %v3150_v9 = vld [vmem:[#allocation5 + $0x44] ss:$16 sps:$4 sm:$0xff]   ;;  %v3152_v10 = vld [vmem:[#allocation5 + $0x4c] ss:$16 sps:$4 sm:$0xff]  }
  0x3b   :  { %507 = vmatprep.subr.bf16.mxu0 %v3144_v5  ;;  %860 = vmatprep.subr.bf16.mxu1 %v3146_v6  ;;  %v3154_v11 = vld [vmem:[#allocation5 + $0x40] ss:$16 sps:$4 sm:$0xff]   ;;  %v3155_v12 = vld [vmem:[#allocation5 + $0x48] ss:$16 sps:$4 sm:$0xff]   ;;  %v3156_v13 = vld [vmem:[#allocation5 + $0x64] ss:$16 sps:$4 sm:$0xff]  }
  0x3c   :  { %v3158_v14 = vld [vmem:[#allocation5 + $0x6c] ss:$16 sps:$4 sm:$0xff]   ;;  %v3160_v15 = vld [vmem:[#allocation5 + $0x60] ss:$16 sps:$4 sm:$0xff]   ;;  %v3161_v16 = vld [vmem:[#allocation5 + $0x68] ss:$16 sps:$4 sm:$0xff]  }
  0x3d   :  { %v3162_v17 = vld [vmem:[#allocation5 + $0x84] ss:$16 sps:$4 sm:$0xff]   ;;  %v3164_v18 = vld [vmem:[#allocation5 + $0x8c] ss:$16 sps:$4 sm:$0xff]   ;;  %v3166_v19 = vld [vmem:[#allocation5 + $0x80] ss:$16 sps:$4 sm:$0xff]  }
  0x3e   :  { %508 = vmatpush1.bf16.msra.mxu0 %v3148_v7  ;;  %861 = vmatpush1.bf16.msra.mxu1 %v3149_v8  ;;  %v3167_v20 = vld [vmem:[#allocation5 + $0x88] ss:$16 sps:$4 sm:$0xff]   ;;  %v3168_v21 = vld [vmem:[#allocation5 + $0xa4] ss:$16 sps:$4 sm:$0xff]   ;;  %v3170_v22 = vld [vmem:[#allocation5 + $0xac] ss:$16 sps:$4 sm:$0xff]  }
  0x3f   :  { %509 = vmatprep.subr.bf16.mxu0 %v3150_v9  ;;  %862 = vmatprep.subr.bf16.mxu1 %v3152_v10  ;;  %v3172_v23 = vld [vmem:[#allocation5 + $0xa0] ss:$16 sps:$4 sm:$0xff]   ;;  %v3173_v24 = vld [vmem:[#allocation5 + $0xa8] ss:$16 sps:$4 sm:$0xff]   ;;  %v3174_v25 = vld [vmem:[#allocation5 + $0xc4] ss:$16 sps:$4 sm:$0xff]  }
  0x40   :  { %v3176_v26 = vld [vmem:[#allocation5 + $0xcc] ss:$16 sps:$4 sm:$0xff]   ;;  %v3178_v27 = vld [vmem:[#allocation5 + $0xc0] ss:$16 sps:$4 sm:$0xff]   ;;  %v3179_v28 = vld [vmem:[#allocation5 + $0xc8] ss:$16 sps:$4 sm:$0xff]  }
  0x41   :  { %v3180_v29 = vld [vmem:[#allocation5 + $0xe4] ss:$16 sps:$4 sm:$0xff]   ;;  %v3182_v30 = vld [vmem:[#allocation5 + $0xec] ss:$16 sps:$4 sm:$0xff]   ;;  %v3184_v31 = vld [vmem:[#allocation5 + $0xe0] ss:$16 sps:$4 sm:$0xff]  }
  0x42   :  { %510 = vmatpush1.bf16.msra.mxu0 %v3154_v11  ;;  %863 = vmatpush1.bf16.msra.mxu1 %v3155_v12  ;;  %v3185_v32 = vld [vmem:[#allocation5 + $0xe8] ss:$16 sps:$4 sm:$0xff]   ;;  %v3186_v33 = vld [vmem:[#allocation2] sm:$0xff]   ;;  %v3195_v39 = vld [vmem:[#allocation7 + $0x10] sm:$0xff]   ;;  %s3352_s2 = smov [#allocation8]  }
  0x43   :  { %511 = vmatprep.subr.bf16.mxu0 %v3156_v13  ;;  %864 = vmatprep.subr.bf16.mxu1 %v3158_v14  ;;  %v3187_v34 = vld [vmem:[#allocation7] sm:$0xff]   ;;  %v3192_v37 = vld [vmem:[#allocation7 + $0x88] sm:$0xff]   ;;  %v3196_v40 = vld [vmem:[#allocation7 + $0x90] sm:$0xff]   ;;  %s2954_s23 = sshll.u32 %s3352_s2, 4  ;;  %s2955_s23 = int_to_ptr.vmem [resolvable:$true] %s2954_s23 }
  0x44   :  { %v3188_v35 = vld [vmem:[#allocation7 + $0x80] sm:$0xff]   ;;  %v3189_v38 = vld [vmem:[#allocation2 + $0x8] sm:$0xff]   ;;  %v3199_v41 = vld [vmem:[#allocation7 + $0x18] sm:$0xff]   ;;  %s3316_s24 = scalar_lea.vmem %s2955_s23, 8192  ;;  %p3321_p11 = scmp.lt.s32.totalorder %s2955_s23, %s2955_s23 }
  0x45   :  { %v3200_v42 = vld [vmem:[#allocation7 + $0x98] sm:$0xff]   ;;  %v3190_v43 = vld [vmem:[#allocation2 + $0x10] sm:$0xff]   ;;  %v3203_v44 = vld [vmem:[#allocation7 + $0x20] sm:$0xff]   ;;  %p3317_p10 = scmp.ne.s32.totalorder %s2955_s23, %s3316_s24  ;;  %p3322_p12 = scmp.lt.s32.totalorder %s3316_s24, %s3316_s24 }
  0x46   :  { %512 = vmatpush1.bf16.msra.mxu0 %v3160_v15  ;;  %865 = vmatpush1.bf16.msra.mxu1 %v3161_v16  ;;  %v3204_v45 = vld [vmem:[#allocation7 + $0xa0] sm:$0xff]   ;;  %v3207_v46 = vld [vmem:[#allocation7 + $0x28] sm:$0xff]   ;;  %v3193_v48 = vld [vmem:[#allocation2 + $0x18] sm:$0xff]  }
  0x47   :  { %513 = vmatprep.subr.bf16.mxu0 %v3162_v17  ;;  %866 = vmatprep.subr.bf16.mxu1 %v3164_v18  ;;  %v3208_v47 = vld [vmem:[#allocation7 + $0xa8] sm:$0xff]   ;;  %v3211_v49 = vld [vmem:[#allocation7 + $0x30] sm:$0xff]   ;;  %v3215_v51 = vld [vmem:[#allocation7 + $0x38] sm:$0xff]   ;;  %p3323_p13 = por %p3322_p12, %p3321_p11 }
  0x48   :  { %v3212_v50 = vld [vmem:[#allocation7 + $0xb0] sm:$0xff]   ;;  %v3216_v52 = vld [vmem:[#allocation7 + $0xb8] sm:$0xff]   ;;  %v3194_v53 = vld [vmem:[#allocation2 + $0x20] sm:$0xff]  }
  0x49   :  { %v3219_v54 = vld [vmem:[#allocation7 + $0x40] sm:$0xff]   ;;  %v3223_v56 = vld [vmem:[#allocation7 + $0x48] sm:$0xff]   ;;  %v3227_v59 = vld [vmem:[#allocation7 + $0x50] sm:$0xff]   ;;  %p3324_p0 = pnand %p3323_p13, %p3317_p10 }
  0x4a   :  { %514 = vmatpush1.bf16.msra.mxu0 %v3166_v19  ;;  %867 = vmatpush1.bf16.msra.mxu1 %v3167_v20  ;;  %v3220_v55 = vld [vmem:[#allocation7 + $0xc0] sm:$0xff]   ;;  %v3224_v57 = vld [vmem:[#allocation7 + $0xc8] sm:$0xff]   ;;  %v3228_v60 = vld [vmem:[#allocation7 + $0xd0] sm:$0xff]  }
  0x4b   :  { %515 = vmatprep.subr.bf16.mxu0 %v3168_v21  ;;  %868 = vmatprep.subr.bf16.mxu1 %v3170_v22  ;;  %v3197_v58 = vld [vmem:[#allocation2 + $0x28] sm:$0xff]   ;;  %v3198_v61 = vld [vmem:[#allocation2 + $0x30] sm:$0xff]   ;;  %v3231_v62 = vld [vmem:[#allocation7 + $0x58] sm:$0xff]  }
  0x4c   :  { %v3232_v63 = vld [vmem:[#allocation7 + $0xd8] sm:$0xff]   ;;  %v3202_v2 = vld [vmem:[#allocation2 + $0x40] sm:$0xff]   ;;  %v3205_v5 = vld [vmem:[#allocation2 + $0x48] sm:$0xff]  }
  0x4d   :  { %v3201_v1 = vld [vmem:[#allocation2 + $0x38] sm:$0xff]   ;;  %v3235_v3 = vld [vmem:[#allocation7 + $0x60] sm:$0xff]   ;;  %v3206_v6 = vld [vmem:[#allocation2 + $0x50] sm:$0xff]  }
  0x4e   :  { %516 = vmatpush1.bf16.msra.mxu0 %v3172_v23  ;;  %869 = vmatpush1.bf16.msra.mxu1 %v3173_v24  ;;  %v3236_v4 = vld [vmem:[#allocation7 + $0xe0] sm:$0xff]   ;;  %v3239_v7 = vld [vmem:[#allocation7 + $0x68] sm:$0xff]   ;;  %v3209_v9 = vld [vmem:[#allocation2 + $0x58] sm:$0xff]  }
  0x4f   :  { %517 = vmatprep.subr.bf16.mxu0 %v3174_v25  ;;  %870 = vmatprep.subr.bf16.mxu1 %v3176_v26  ;;  %v3240_v8 = vld [vmem:[#allocation7 + $0xe8] sm:$0xff]   ;;  %v3210_v10 = vld [vmem:[#allocation2 + $0x60] sm:$0xff]   ;;  %v3243_v11 = vld [vmem:[#allocation7 + $0x70] sm:$0xff]  }
  0x50   :  { %v3244_v12 = vld [vmem:[#allocation7 + $0xf0] sm:$0xff]   ;;  %v3213_v13 = vld [vmem:[#allocation2 + $0x68] sm:$0xff]   ;;  %v3247_v15 = vld [vmem:[#allocation7 + $0x78] sm:$0xff]  }
  0x51   :  { %v3214_v14 = vld [vmem:[#allocation2 + $0x70] sm:$0xff]   ;;  %v3248_v16 = vld [vmem:[#allocation7 + $0xf8] sm:$0xff]   ;;  %v3218_v18 = vld [vmem:[#allocation2 + $0x80] sm:$0xff]  }
  0x52   :  { %518 = vmatpush1.bf16.msra.mxu0 %v3178_v27  ;;  %871 = vmatpush1.bf16.msra.mxu1 %v3179_v28  ;;  %v3217_v17 = vld [vmem:[#allocation2 + $0x78] sm:$0xff]   ;;  %v3221_v19 = vld [vmem:[#allocation2 + $0x88] sm:$0xff]   ;;  %v3222_v20 = vld [vmem:[#allocation2 + $0x90] sm:$0xff]  }
  0x53   :  { %519 = vmatprep.subr.bf16.mxu0 %v3180_v29  ;;  %872 = vmatprep.subr.bf16.mxu1 %v3182_v30  ;;  %v3225_v21 = vld [vmem:[#allocation2 + $0x98] sm:$0xff]   ;;  %v3226_v22 = vld [vmem:[#allocation2 + $0xa0] sm:$0xff]   ;;  %v3229_v23 = vld [vmem:[#allocation2 + $0xa8] sm:$0xff]  }
  0x54   :  { %v3230_v24 = vld [vmem:[#allocation2 + $0xb0] sm:$0xff]   ;;  %v3233_v25 = vld [vmem:[#allocation2 + $0xb8] sm:$0xff]   ;;  %v3234_v26 = vld [vmem:[#allocation2 + $0xc0] sm:$0xff]  }
  0x55   :  { %v3237_v27 = vld [vmem:[#allocation2 + $0xc8] sm:$0xff]   ;;  %v3238_v28 = vld [vmem:[#allocation2 + $0xd0] sm:$0xff]  }
  0x56   :  { %520 = vmatpush1.bf16.msra.mxu0 %v3184_v31  ;;  %873 = vmatpush1.bf16.msra.mxu1 %v3185_v32 }
  0x57   :  { %2107 = vmatprep.subr.bf16.mxu1 %v3351_v0  ;;  %2396 = vmatprep.subr.bf16.mxu0 %v3351_v0 }
  0x59   :  { %538 = vmatmul.mubr.bf16.vlgmr.msra.gmra.mrb[0].mxu0 %v3186_v33  ;;  %891 = vmatmul.mubr.bf16.vlgmr.msra.gmra.mrb[0].mxu1 %v3186_v33 }
  0x5a   :  { %2108 = vmatpush1.bf16.msra.mxu1 %v3187_v34  ;;  %2397 = vmatpush1.bf16.msra.mxu0 %v3188_v35  ;;  %v3241_v35 = vld [vmem:[#allocation2 + $0xd8] sm:$0xff]  }
  0x5b   :  { %547 = vmatprep.mubr.bf16.mxu0 %v3351_v0  ;;  %900 = vmatprep.mubr.bf16.mxu1 %v3351_v0 }
  0x5c   :  { %2109 = vmatprep.subr.bf16.mxu1 %v3351_v0  ;;  %2398 = vmatprep.subr.bf16.mxu0 %v3351_v0 }
  0x5e   :  { %2110 = vmatpush1.bf16.msra.mxu1 %v3191_v36  ;;  %2399 = vmatpush1.bf16.msra.mxu0 %v3192_v37 }
  0x5f   :  { %2111 = vmatprep.subr.bf16.mxu1 %v3351_v0  ;;  %2400 = vmatprep.subr.bf16.mxu0 %v3351_v0 }
  0x61   :  { %548 = vmatmul.mubr.bf16.gmra.mrb[4].mxu0 %v3189_v38  ;;  %901 = vmatmul.mubr.bf16.gmra.mrb[4].mxu1 %v3189_v38 }
  0x62   :  { %557 = vmatprep.mubr.bf16.mxu0 %v3351_v0  ;;  %910 = vmatprep.mubr.bf16.mxu1 %v3351_v0 }
  0x63   :  { %2112 = vmatpush1.bf16.msra.mxu1 %v3195_v39  ;;  %2401 = vmatpush1.bf16.msra.mxu0 %v3196_v40 }
  0x64   :  { %2113 = vmatprep.subr.bf16.mxu1 %v3351_v0  ;;  %2402 = vmatprep.subr.bf16.mxu0 %v3351_v0 }
  0x67   :  { %2114 = vmatpush1.bf16.msra.mxu1 %v3199_v41  ;;  %2403 = vmatpush1.bf16.msra.mxu0 %v3200_v42 }
  0x68   :  { %2115 = vmatprep.subr.bf16.mxu1 %v3351_v0  ;;  %2404 = vmatprep.subr.bf16.mxu0 %v3351_v0 }
  0x69   :  { %558 = vmatmul.mubr.bf16.gmra.mrb[8].mxu0 %v3190_v43  ;;  %911 = vmatmul.mubr.bf16.gmra.mrb[8].mxu1 %v3190_v43 }
  0x6a   :  { %567 = vmatprep.mubr.bf16.mxu0 %v3351_v0  ;;  %920 = vmatprep.mubr.bf16.mxu1 %v3351_v0 }
  0x6b   :  { %2116 = vmatpush1.bf16.msra.mxu1 %v3203_v44  ;;  %2405 = vmatpush1.bf16.msra.mxu0 %v3204_v45 }
  0x6c   :  { %2117 = vmatprep.subr.bf16.mxu1 %v3351_v0  ;;  %2406 = vmatprep.subr.bf16.mxu0 %v3351_v0 }
  0x6f   :  { %2118 = vmatpush1.bf16.msra.mxu1 %v3207_v46  ;;  %2407 = vmatpush1.bf16.msra.mxu0 %v3208_v47 }
  0x70   :  { %2119 = vmatprep.subr.bf16.mxu1 %v3351_v0  ;;  %2408 = vmatprep.subr.bf16.mxu0 %v3351_v0 }
  0x71   :  { %568 = vmatmul.mubr.bf16.gmra.mrb[12].mxu0 %v3193_v48  ;;  %921 = vmatmul.mubr.bf16.gmra.mrb[12].mxu1 %v3193_v48 }
  0x72   :  { %577 = vmatprep.mubr.bf16.mxu0 %v3351_v0  ;;  %930 = vmatprep.mubr.bf16.mxu1 %v3351_v0 }
  0x73   :  { %2120 = vmatpush1.bf16.msra.mxu1 %v3211_v49  ;;  %2409 = vmatpush1.bf16.msra.mxu0 %v3212_v50 }
  0x74   :  { %2121 = vmatprep.subr.bf16.mxu1 %v3351_v0  ;;  %2410 = vmatprep.subr.bf16.mxu0 %v3351_v0 }
  0x77   :  { %2122 = vmatpush1.bf16.msra.mxu1 %v3215_v51  ;;  %2411 = vmatpush1.bf16.msra.mxu0 %v3216_v52 }
  0x78   :  { %2123 = vmatprep.subr.bf16.mxu1 %v3351_v0  ;;  %2412 = vmatprep.subr.bf16.mxu0 %v3351_v0 }
  0x79   :  { %578 = vmatmul.mubr.bf16.gmra.mrb[16].mxu0 %v3194_v53  ;;  %931 = vmatmul.mubr.bf16.gmra.mrb[16].mxu1 %v3194_v53 }
  0x7a   :  { %587 = vmatprep.mubr.bf16.mxu0 %v3351_v0  ;;  %940 = vmatprep.mubr.bf16.mxu1 %v3351_v0 }
  0x7b   :  { %2124 = vmatpush1.bf16.msra.mxu1 %v3219_v54  ;;  %2413 = vmatpush1.bf16.msra.mxu0 %v3220_v55 }
  0x7c   :  { %2125 = vmatprep.subr.bf16.mxu1 %v3351_v0  ;;  %2414 = vmatprep.subr.bf16.mxu0 %v3351_v0 }
  0x7f   :  { %2126 = vmatpush1.bf16.msra.mxu1 %v3223_v56  ;;  %2415 = vmatpush1.bf16.msra.mxu0 %v3224_v57 }
  0x80   :  { %2127 = vmatprep.subr.bf16.mxu1 %v3351_v0  ;;  %2416 = vmatprep.subr.bf16.mxu0 %v3351_v0 }
  0x81   :  { %588 = vmatmul.mubr.bf16.gmra.mrb[20].mxu0 %v3197_v58  ;;  %941 = vmatmul.mubr.bf16.gmra.mrb[20].mxu1 %v3197_v58 }
  0x82   :  { %597 = vmatprep.mubr.bf16.mxu0 %v3351_v0  ;;  %950 = vmatprep.mubr.bf16.mxu1 %v3351_v0 }
  0x83   :  { %2128 = vmatpush1.bf16.msra.mxu1 %v3227_v59  ;;  %2417 = vmatpush1.bf16.msra.mxu0 %v3228_v60 }
  0x84   :  { %2129 = vmatprep.subr.bf16.mxu1 %v3351_v0  ;;  %2418 = vmatprep.subr.bf16.mxu0 %v3351_v0 }
  0x87   :  { %2130 = vmatpush1.bf16.msra.mxu1 %v3231_v62  ;;  %2419 = vmatpush1.bf16.msra.mxu0 %v3232_v63 }
  0x88   :  { %2131 = vmatprep.subr.bf16.mxu1 %v3351_v0  ;;  %2420 = vmatprep.subr.bf16.mxu0 %v3351_v0 }
  0x89   :  { %598 = vmatmul.mubr.bf16.gmra.mrb[24].mxu0 %v3198_v61  ;;  %951 = vmatmul.mubr.bf16.gmra.mrb[24].mxu1 %v3198_v61 }
  0x8a   :  { %607 = vmatprep.mubr.bf16.mxu0 %v3351_v0  ;;  %960 = vmatprep.mubr.bf16.mxu1 %v3351_v0 }
  0x8b   :  { %2132 = vmatpush1.bf16.msra.mxu1 %v3235_v3  ;;  %2421 = vmatpush1.bf16.msra.mxu0 %v3236_v4 }
  0x8c   :  { %2133 = vmatprep.subr.bf16.mxu1 %v3351_v0  ;;  %2422 = vmatprep.subr.bf16.mxu0 %v3351_v0 }
  0x8f   :  { %2134 = vmatpush1.bf16.msra.mxu1 %v3239_v7  ;;  %2423 = vmatpush1.bf16.msra.mxu0 %v3240_v8 }
  0x90   :  { %2135 = vmatprep.subr.bf16.mxu1 %v3351_v0  ;;  %2424 = vmatprep.subr.bf16.mxu0 %v3351_v0 }
  0x91   :  { %608 = vmatmul.mubr.bf16.gmra.mrb[28].mxu0 %v3201_v1  ;;  %961 = vmatmul.mubr.bf16.gmra.mrb[28].mxu1 %v3201_v1  ;;  %v3242_v1 = vld [vmem:[#allocation2 + $0xe0] sm:$0xff]  }
  0x92   :  { %617 = vmatprep.mubr.bf16.mxu0 %v3351_v0  ;;  %970 = vmatprep.mubr.bf16.mxu1 %v3351_v0 }
  0x93   :  { %2136 = vmatpush1.bf16.msra.mxu1 %v3243_v11  ;;  %2425 = vmatpush1.bf16.msra.mxu0 %v3244_v12 }
  0x94   :  { %2137 = vmatprep.subr.bf16.mxu1 %v3351_v0  ;;  %2426 = vmatprep.subr.bf16.mxu0 %v3351_v0 }
  0x97   :  { %2138 = vmatpush1.bf16.msra.mxu1 %v3247_v15  ;;  %2427 = vmatpush1.bf16.msra.mxu0 %v3248_v16 }
  0x99   :  { %618 = vmatmul.mubr.bf16.gmra.mrb[32].mxu0 %v3202_v2  ;;  %971 = vmatmul.mubr.bf16.gmra.mrb[32].mxu1 %v3202_v2 }
  0x9a   :  { %627 = vmatprep.mubr.bf16.mxu0 %v3351_v0  ;;  %980 = vmatprep.mubr.bf16.mxu1 %v3351_v0 }
  0xa1   :  { %628 = vmatmul.mubr.bf16.gmra.mrb[36].mxu0 %v3205_v5  ;;  %981 = vmatmul.mubr.bf16.gmra.mrb[36].mxu1 %v3205_v5 }
  0xa2   :  { %637 = vmatprep.mubr.bf16.mxu0 %v3351_v0  ;;  %990 = vmatprep.mubr.bf16.mxu1 %v3351_v0 }
  0xa9   :  { %638 = vmatmul.mubr.bf16.gmra.mrb[40].mxu0 %v3206_v6  ;;  %991 = vmatmul.mubr.bf16.gmra.mrb[40].mxu1 %v3206_v6 }
  0xaa   :  { %647 = vmatprep.mubr.bf16.mxu0 %v3351_v0  ;;  %1000 = vmatprep.mubr.bf16.mxu1 %v3351_v0 }
  0xb1   :  { %648 = vmatmul.mubr.bf16.gmra.mrb[44].mxu0 %v3209_v9  ;;  %1001 = vmatmul.mubr.bf16.gmra.mrb[44].mxu1 %v3209_v9 }
  0xb2   :  { %657 = vmatprep.mubr.bf16.mxu0 %v3351_v0  ;;  %1010 = vmatprep.mubr.bf16.mxu1 %v3351_v0 }
  0xb9   :  { %658 = vmatmul.mubr.bf16.gmra.mrb[48].mxu0 %v3210_v10  ;;  %1011 = vmatmul.mubr.bf16.gmra.mrb[48].mxu1 %v3210_v10 }
  0xba   :  { %667 = vmatprep.mubr.bf16.mxu0 %v3351_v0  ;;  %1020 = vmatprep.mubr.bf16.mxu1 %v3351_v0 }
  0xc1   :  { %668 = vmatmul.mubr.bf16.gmra.mrb[52].mxu0 %v3213_v13  ;;  %1021 = vmatmul.mubr.bf16.gmra.mrb[52].mxu1 %v3213_v13 }
  0xc2   :  { %677 = vmatprep.mubr.bf16.mxu0 %v3351_v0  ;;  %1030 = vmatprep.mubr.bf16.mxu1 %v3351_v0 }
  0xc9   :  { %678 = vmatmul.mubr.bf16.gmra.mrb[56].mxu0 %v3214_v14  ;;  %1031 = vmatmul.mubr.bf16.gmra.mrb[56].mxu1 %v3214_v14 }
  0xca   :  { %687 = vmatprep.mubr.bf16.mxu0 %v3351_v0  ;;  %1040 = vmatprep.mubr.bf16.mxu1 %v3351_v0 }
  0xd1   :  { %688 = vmatmul.mubr.bf16.gmra.mrb[60].mxu0 %v3217_v17  ;;  %1041 = vmatmul.mubr.bf16.gmra.mrb[60].mxu1 %v3217_v17 }
  0xd2   :  { %697 = vmatprep.mubr.bf16.mxu0 %v3351_v0  ;;  %1050 = vmatprep.mubr.bf16.mxu1 %v3351_v0 }
  0xd9   :  { %698 = vmatmul.mubr.bf16.gmra.mrb[64].mxu0 %v3218_v18  ;;  %1051 = vmatmul.mubr.bf16.gmra.mrb[64].mxu1 %v3218_v18 }
  0xda   :  { %707 = vmatprep.mubr.bf16.mxu0 %v3351_v0  ;;  %1060 = vmatprep.mubr.bf16.mxu1 %v3351_v0 }
  0xe1   :  { %708 = vmatmul.mubr.bf16.gmra.mrb[68].mxu0 %v3221_v19  ;;  %1061 = vmatmul.mubr.bf16.gmra.mrb[68].mxu1 %v3221_v19 }
  0xe2   :  { %717 = vmatprep.mubr.bf16.mxu0 %v3351_v0  ;;  %1070 = vmatprep.mubr.bf16.mxu1 %v3351_v0 }
  0xe9   :  { %718 = vmatmul.mubr.bf16.gmra.mrb[72].mxu0 %v3222_v20  ;;  %1071 = vmatmul.mubr.bf16.gmra.mrb[72].mxu1 %v3222_v20 }
  0xea   :  { %727 = vmatprep.mubr.bf16.mxu0 %v3351_v0  ;;  %1080 = vmatprep.mubr.bf16.mxu1 %v3351_v0 }
  0xf1   :  { %728 = vmatmul.mubr.bf16.gmra.mrb[76].mxu0 %v3225_v21  ;;  %1081 = vmatmul.mubr.bf16.gmra.mrb[76].mxu1 %v3225_v21 }
  0xf2   :  { %737 = vmatprep.mubr.bf16.mxu0 %v3351_v0  ;;  %1090 = vmatprep.mubr.bf16.mxu1 %v3351_v0 }
  0xf9   :  { %738 = vmatmul.mubr.bf16.gmra.mrb[80].mxu0 %v3226_v22  ;;  %1091 = vmatmul.mubr.bf16.gmra.mrb[80].mxu1 %v3226_v22 }
  0xfa   :  { %747 = vmatprep.mubr.bf16.mxu0 %v3351_v0  ;;  %1100 = vmatprep.mubr.bf16.mxu1 %v3351_v0 }
 0x101   :  { %748 = vmatmul.mubr.bf16.gmra.mrb[84].mxu0 %v3229_v23  ;;  %1101 = vmatmul.mubr.bf16.gmra.mrb[84].mxu1 %v3229_v23 }
 0x102   :  { %757 = vmatprep.mubr.bf16.mxu0 %v3351_v0  ;;  %1110 = vmatprep.mubr.bf16.mxu1 %v3351_v0 }
 0x109   :  { %758 = vmatmul.mubr.bf16.gmra.mrb[88].mxu0 %v3230_v24  ;;  %1111 = vmatmul.mubr.bf16.gmra.mrb[88].mxu1 %v3230_v24 }
 0x10a   :  { %767 = vmatprep.mubr.bf16.mxu0 %v3351_v0  ;;  %1120 = vmatprep.mubr.bf16.mxu1 %v3351_v0 }
 0x111   :  { %768 = vmatmul.mubr.bf16.gmra.mrb[92].mxu0 %v3233_v25  ;;  %1121 = vmatmul.mubr.bf16.gmra.mrb[92].mxu1 %v3233_v25 }
 0x112   :  { %777 = vmatprep.mubr.bf16.mxu0 %v3351_v0  ;;  %1130 = vmatprep.mubr.bf16.mxu1 %v3351_v0 }
 0x119   :  { %778 = vmatmul.mubr.bf16.gmra.mrb[96].mxu0 %v3234_v26  ;;  %1131 = vmatmul.mubr.bf16.gmra.mrb[96].mxu1 %v3234_v26 }
 0x11a   :  { %787 = vmatprep.mubr.bf16.mxu0 %v3351_v0  ;;  %1140 = vmatprep.mubr.bf16.mxu1 %v3351_v0 }
 0x121   :  { %788 = vmatmul.mubr.bf16.gmra.mrb[100].mxu0 %v3237_v27  ;;  %1141 = vmatmul.mubr.bf16.gmra.mrb[100].mxu1 %v3237_v27 }
 0x122   :  { %797 = vmatprep.mubr.bf16.mxu0 %v3351_v0  ;;  %1150 = vmatprep.mubr.bf16.mxu1 %v3351_v0 }
 0x129   :  { %798 = vmatmul.mubr.bf16.gmra.mrb[104].mxu0 %v3238_v28  ;;  %1151 = vmatmul.mubr.bf16.gmra.mrb[104].mxu1 %v3238_v28 }
 0x12a   :  { %807 = vmatprep.mubr.bf16.mxu0 %v3351_v0  ;;  %1160 = vmatprep.mubr.bf16.mxu1 %v3351_v0 }
 0x12c   :  { %v539_v29 = vpop.f32.mrb[0].mxu0  ;;  %v892_v30 = vpop.f32.mrb[0].mxu1 }
 0x12d   :  { %v1211_v31 = vmax.f32 %v539_v29, 0.0  ;;  %v1213_v32 = vmax.f32 %v892_v30, 0.0  ;;  %v541_v33 = vpop.f32.mrb[1].mxu0  ;;  %v894_v34 = vpop.f32.mrb[1].mxu1  ;;  %v3245_v30 = vld [vmem:[#allocation2 + $0xe8] sm:$0xff]  }
 0x12e   :  { %v1212_v36 = vmax.f32 %v541_v33, 0.0  ;;  %v1214_v37 = vmax.f32 %v894_v34, 0.0  ;;  %v543_v38 = vpop.f32.mrb[2].mxu0  ;;  %v896_v39 = vpop.f32.mrb[2].mxu1 }
 0x12f   :  { %v1215_v40 = vmax.f32 %v543_v38, 0.0  ;;  %v1217_v41 = vmax.f32 %v896_v39, 0.0  ;;  %v545_v42 = vpop.f32.mrb[3].mxu0  ;;  %v898_v43 = vpop.f32.mrb[3].mxu1  ;;  %v3499_v44 = vmul.f32 %v1211_v31, %v1211_v31  ;;  %v3501_v45 = vmul.f32 %v1213_v32, %v1213_v32 }
 0x130   :  { %v1216_v46 = vmax.f32 %v545_v42, 0.0  ;;  %v1218_v47 = vmax.f32 %v898_v43, 0.0  ;;  %v3503_v48 = vmul.f32 %v1212_v36, %v1212_v36  ;;  %v3509_v51 = vmul.f32 %v1214_v37, %v1214_v37 }
 0x131   :  { %v3505_v49 = vmul.f32 %v1215_v40, %v1215_v40  ;;  %v3507_v50 = vmul.f32 %v1217_v41, %v1217_v41  ;;  %808 = vmatmul.mubr.bf16.gmra.mrb[108].mxu0 %v3241_v35  ;;  %1161 = vmatmul.mubr.bf16.gmra.mrb[108].mxu1 %v3241_v35 }
 0x132   :  { %v3511_v52 = vmul.f32 %v1216_v46, %v1216_v46  ;;  %v3513_v53 = vmul.f32 %v1218_v47, %v1218_v47  ;;  %817 = vmatprep.mubr.bf16.mxu0 %v3351_v0  ;;  %1170 = vmatprep.mubr.bf16.mxu1 %v3351_v0 }
 0x133   :  { %v1723_v54 = vpack.c.bf16 %v3505_v49, %v3499_v44  ;;  %v1725_v55 = vpack.c.bf16 %v3507_v50, %v3501_v45 }
 0x134   :  { %v1724_v56 = vpack.c.bf16 %v3511_v52, %v3503_v48  ;;  %v1726_v57 = vpack.c.bf16 %v3513_v53, %v3509_v51  ;;  %v549_v58 = vpop.f32.mrb[4].mxu0  ;;  %v902_v59 = vpop.f32.mrb[4].mxu1 }
 0x135   :  { %v1219_v60 = vmax.f32 %v549_v58, 0.0  ;;  %v1221_v61 = vmax.f32 %v902_v59, 0.0  ;;  %v551_v62 = vpop.f32.mrb[5].mxu0  ;;  %v904_v63 = vpop.f32.mrb[5].mxu1 }
 0x136   :  { %v1220_v2 = vmax.f32 %v551_v62, 0.0  ;;  %v1222_v3 = vmax.f32 %v904_v63, 0.0  ;;  %v553_v4 = vpop.f32.mrb[6].mxu0  ;;  %v906_v5 = vpop.f32.mrb[6].mxu1 }
 0x137   :  { %v1223_v6 = vmax.f32 %v553_v4, 0.0  ;;  %v1225_v7 = vmax.f32 %v906_v5, 0.0  ;;  %v555_v8 = vpop.f32.mrb[7].mxu0  ;;  %v908_v9 = vpop.f32.mrb[7].mxu1  ;;  %v3525_v10 = vmul.f32 %v1219_v60, %v1219_v60  ;;  %v3527_v11 = vmul.f32 %v1221_v61, %v1221_v61 }
 0x138   :  { %v1224_v12 = vmax.f32 %v555_v8, 0.0  ;;  %v1226_v13 = vmax.f32 %v908_v9, 0.0  ;;  %v3529_v14 = vmul.f32 %v1220_v2, %v1220_v2  ;;  %v3535_v17 = vmul.f32 %v1222_v3, %v1222_v3  ;;  %v3246_v8 = vld [vmem:[#allocation2 + $0xf0] sm:$0xff]  }
 0x139   :  { %v3531_v15 = vmul.f32 %v1223_v6, %v1223_v6  ;;  %v3533_v16 = vmul.f32 %v1225_v7, %v1225_v7  ;;  %818 = vmatmul.mubr.bf16.gmra.mrb[112].mxu0 %v3242_v1  ;;  %1171 = vmatmul.mubr.bf16.gmra.mrb[112].mxu1 %v3242_v1 }
 0x13a   :  { %v3537_v18 = vmul.f32 %v1224_v12, %v1224_v12  ;;  %v3539_v19 = vmul.f32 %v1226_v13, %v1226_v13  ;;  %827 = vmatprep.mubr.bf16.mxu0 %v3351_v0  ;;  %1180 = vmatprep.mubr.bf16.mxu1 %v3351_v0 }
 0x13b   :  { %v1727_v20 = vpack.c.bf16 %v3531_v15, %v3525_v10  ;;  %v1729_v21 = vpack.c.bf16 %v3533_v16, %v3527_v11 }
 0x13c   :  { %v1728_v22 = vpack.c.bf16 %v3537_v18, %v3529_v14  ;;  %v1730_v23 = vpack.c.bf16 %v3539_v19, %v3535_v17  ;;  %v559_v24 = vpop.f32.mrb[8].mxu0  ;;  %v912_v25 = vpop.f32.mrb[8].mxu1 }
 0x13d   :  { %v1227_v26 = vmax.f32 %v559_v24, 0.0  ;;  %v1229_v27 = vmax.f32 %v912_v25, 0.0  ;;  %v561_v28 = vpop.f32.mrb[9].mxu0  ;;  %v914_v29 = vpop.f32.mrb[9].mxu1 }
 0x13e   :  { %v1228_v31 = vmax.f32 %v561_v28, 0.0  ;;  %v1230_v32 = vmax.f32 %v914_v29, 0.0  ;;  %v563_v33 = vpop.f32.mrb[10].mxu0  ;;  %v916_v34 = vpop.f32.mrb[10].mxu1 }
 0x13f   :  { %v1231_v35 = vmax.f32 %v563_v33, 0.0  ;;  %v1233_v36 = vmax.f32 %v916_v34, 0.0  ;;  %v565_v37 = vpop.f32.mrb[11].mxu0  ;;  %v918_v38 = vpop.f32.mrb[11].mxu1  ;;  %v3551_v39 = vmul.f32 %v1227_v26, %v1227_v26  ;;  %v3553_v40 = vmul.f32 %v1229_v27, %v1229_v27 }
 0x140   :  { %v1232_v41 = vmax.f32 %v565_v37, 0.0  ;;  %v1234_v42 = vmax.f32 %v918_v38, 0.0  ;;  %v3555_v43 = vmul.f32 %v1228_v31, %v1228_v31  ;;  %v3561_v58 = vmul.f32 %v1230_v32, %v1230_v32 }
 0x141   :  { %v3557_v46 = vmul.f32 %v1231_v35, %v1231_v35  ;;  %v3559_v47 = vmul.f32 %v1233_v36, %v1233_v36  ;;  %828 = vmatmul.mubr.bf16.gmra.mrb[116].mxu0 %v3245_v30  ;;  %1181 = vmatmul.mubr.bf16.gmra.mrb[116].mxu1 %v3245_v30 }
 0x142   :  { %v3563_v59 = vmul.f32 %v1232_v41, %v1232_v41  ;;  %v3565_v60 = vmul.f32 %v1234_v42, %v1234_v42  ;;  %837 = vmatprep.mubr.bf16.mxu0 %v3351_v0  ;;  %1190 = vmatprep.mubr.bf16.mxu1 %v3351_v0 }
 0x143   :  { %v1731_v61 = vpack.c.bf16 %v3557_v46, %v3551_v39 }
 0x144   :  { %v1732_v63 = vpack.c.bf16 %v3563_v59, %v3555_v43  ;;  %v1734_v1 = vpack.c.bf16 %v3565_v60, %v3561_v58  ;;  %v569_v2 = vpop.f32.mrb[12].mxu0  ;;  %v922_v3 = vpop.f32.mrb[12].mxu1 }
 0x145   :  { %v1235_v4 = vmax.f32 %v569_v2, 0.0  ;;  %v1237_v5 = vmax.f32 %v922_v3, 0.0  ;;  %v571_v6 = vpop.f32.mrb[13].mxu0  ;;  %v924_v7 = vpop.f32.mrb[13].mxu1 }
 0x146   :  { %v1236_v9 = vmax.f32 %v571_v6, 0.0  ;;  %v1238_v12 = vmax.f32 %v924_v7, 0.0  ;;  %v573_v13 = vpop.f32.mrb[14].mxu0  ;;  %v926_v24 = vpop.f32.mrb[14].mxu1 }
 0x147   :  { %v1239_v25 = vmax.f32 %v573_v13, 0.0  ;;  %v1241_v26 = vmax.f32 %v926_v24, 0.0  ;;  %v575_v27 = vpop.f32.mrb[15].mxu0  ;;  %v928_v28 = vpop.f32.mrb[15].mxu1  ;;  %v3577_v29 = vmul.f32 %v1235_v4, %v1235_v4  ;;  %v3579_v30 = vmul.f32 %v1237_v5, %v1237_v5 }
 0x148   :  { %v1240_v31 = vmax.f32 %v575_v27, 0.0  ;;  %v1242_v32 = vmax.f32 %v928_v28, 0.0  ;;  %v3581_v33 = vmul.f32 %v1236_v9, %v1236_v9  ;;  %v3587_v36 = vmul.f32 %v1238_v12, %v1238_v12  ;;  %v3249_v12 = vld [vmem:[#allocation2 + $0xf8] sm:$0xff]  }
 0x149   :  { %v3583_v34 = vmul.f32 %v1239_v25, %v1239_v25  ;;  %v3585_v35 = vmul.f32 %v1241_v26, %v1241_v26  ;;  %838 = vmatmul.mubr.bf16.gmra.mrb[120].mxu0 %v3246_v8  ;;  %1191 = vmatmul.mubr.bf16.gmra.mrb[120].mxu1 %v3246_v8 }
 0x14a   :  { %v3589_v37 = vmul.f32 %v1240_v31, %v1240_v31  ;;  %v3591_v38 = vmul.f32 %v1242_v32, %v1242_v32  ;;  %847 = vmatprep.mubr.bf16.mxu0 %v3351_v0  ;;  %1200 = vmatprep.mubr.bf16.mxu1 %v3351_v0 }
 0x14c   :  { %v579_v4 = vpop.f32.mrb[16].mxu0  ;;  %v932_v5 = vpop.f32.mrb[16].mxu1 }
 0x14d   :  { %v1243_v6 = vmax.f32 %v579_v4, 0.0  ;;  %v1245_v7 = vmax.f32 %v932_v5, 0.0  ;;  %v581_v8 = vpop.f32.mrb[17].mxu0  ;;  %v934_v9 = vpop.f32.mrb[17].mxu1 }
 0x14e   :  { %v1244_v0 = vmax.f32 %v581_v8, 0.0  ;;  %v1246_v13 = vmax.f32 %v934_v9, 0.0  ;;  %v583_v24 = vpop.f32.mrb[18].mxu0  ;;  %v936_v25 = vpop.f32.mrb[18].mxu1 }
 0x14f   :  { %v1247_v26 = vmax.f32 %v583_v24, 0.0  ;;  %v1249_v27 = vmax.f32 %v936_v25, 0.0  ;;  %v585_v28 = vpop.f32.mrb[19].mxu0  ;;  %v938_v31 = vpop.f32.mrb[19].mxu1  ;;  %v3603_v32 = vmul.f32 %v1243_v6, %v1243_v6  ;;  %v3605_v42 = vmul.f32 %v1245_v7, %v1245_v7 }
 0x150   :  { %v1248_v41 = vmax.f32 %v585_v28, 0.0  ;;  %v1250_v3 = vmax.f32 %v938_v31, 0.0  ;;  %v3607_v2 = vmul.f32 %v1244_v0, %v1244_v0  ;;  %v3613_v8 = vmul.f32 %v1246_v13, %v1246_v13 }
 0x151   :  { %v3609_v4 = vmul.f32 %v1247_v26, %v1247_v26  ;;  %v3611_v5 = vmul.f32 %v1249_v27, %v1249_v27  ;;  %848 = vmatmul.mubr.bf16.gmra.mrb[124].mxu0 %v3249_v12  ;;  %1201 = vmatmul.mubr.bf16.gmra.mrb[124].mxu1 %v3249_v12 }
 0x152   :  { %v3615_v9 = vmul.f32 %v1248_v41, %v1248_v41  ;;  %v3617_v24 = vmul.f32 %v1250_v3, %v1250_v3  ;;  %2139 = vmatprep.mubr.bf16.mxu1 %v1724_v56  ;;  %2428 = vmatprep.mubr.bf16.mxu0 %v1726_v57 }
 0x154   :  { %v589_v12 = vpop.f32.mrb[20].mxu0  ;;  %v942_v0 = vpop.f32.mrb[20].mxu1 }
 0x155   :  { %v1251_v48 = vmax.f32 %v589_v12, 0.0  ;;  %v1253_v52 = vmax.f32 %v942_v0, 0.0  ;;  %v591_v56 = vpop.f32.mrb[21].mxu0  ;;  %v944_v13 = vpop.f32.mrb[21].mxu1 }
 0x156   :  { %v1252_v51 = vmax.f32 %v591_v56, 0.0  ;;  %v1254_v53 = vmax.f32 %v944_v13, 0.0  ;;  %v593_v57 = vpop.f32.mrb[22].mxu0  ;;  %v946_v25 = vpop.f32.mrb[22].mxu1 }
 0x157   :  { %v1255_v26 = vmax.f32 %v593_v57, 0.0  ;;  %v1257_v27 = vmax.f32 %v946_v25, 0.0  ;;  %v595_v28 = vpop.f32.mrb[23].mxu0  ;;  %v948_v31 = vpop.f32.mrb[23].mxu1  ;;  %v3633_v7 = vmul.f32 %v1251_v48, %v1251_v48  ;;  %v3635_v6 = vmul.f32 %v1253_v52, %v1253_v52 }
 0x158   :  { %v1256_v41 = vmax.f32 %v595_v28, 0.0  ;;  %v1258_v3 = vmax.f32 %v948_v31, 0.0  ;;  %v3637_v62 = vmul.f32 %v1252_v51, %v1252_v51  ;;  %v3649_v48 = vmul.f32 %v1254_v53, %v1254_v53 }
 0x159   :  { %v3639_v12 = vmul.f32 %v1255_v26, %v1255_v26  ;;  %v3641_v0 = vmul.f32 %v1257_v27, %v1257_v27  ;;  %2140 = vmatmul.mubr.bf16.vlgmr.msra.gmra.mrb[128].mxu1 %v1723_v54  ;;  %2429 = vmatmul.mubr.bf16.vlgmr.msra.gmra.mrb[128].mxu0 %v1725_v55 }
 0x15a   :  { %v3651_v52 = vmul.f32 %v1256_v41, %v1256_v41  ;;  %v3653_v56 = vmul.f32 %v1258_v3, %v1258_v3  ;;  %2147 = vmatprep.mubr.bf16.mxu1 %v1728_v22  ;;  %2436 = vmatprep.mubr.bf16.mxu0 %v1730_v23 }
 0x15b   :  { %v1743_v44 = vpack.c.bf16 %v3639_v12, %v3633_v7  ;;  %v1745_v45 = vpack.c.bf16 %v3641_v0, %v3635_v6 }
 0x15c   :  { %v1744_v49 = vpack.c.bf16 %v3651_v52, %v3637_v62  ;;  %v1746_v50 = vpack.c.bf16 %v3653_v56, %v3649_v48  ;;  %v599_v54 = vpop.f32.mrb[24].mxu0  ;;  %v952_v55 = vpop.f32.mrb[24].mxu1 }
 0x15d   :  { %v1259_v14 = vmax.f32 %v599_v54, 0.0  ;;  %v1261_v18 = vmax.f32 %v952_v55, 0.0  ;;  %v601_v22 = vpop.f32.mrb[25].mxu0  ;;  %v954_v41 = vpop.f32.mrb[25].mxu1 }
 0x15e   :  { %v1260_v17 = vmax.f32 %v601_v22, 0.0  ;;  %v1262_v19 = vmax.f32 %v954_v41, 0.0  ;;  %v603_v23 = vpop.f32.mrb[26].mxu0  ;;  %v956_v3 = vpop.f32.mrb[26].mxu1 }
 0x15f   :  { %v1263_v13 = vmax.f32 %v603_v23, 0.0  ;;  %v1265_v51 = vmax.f32 %v956_v3, 0.0  ;;  %v605_v53 = vpop.f32.mrb[27].mxu0  ;;  %v958_v57 = vpop.f32.mrb[27].mxu1  ;;  %v3669_v25 = vmul.f32 %v1259_v14, %v1259_v14  ;;  %v3671_v26 = vmul.f32 %v1261_v18, %v1261_v18 }
 0x160   :  { %v1264_v27 = vmax.f32 %v605_v53, 0.0  ;;  %v1266_v28 = vmax.f32 %v958_v57, 0.0  ;;  %v3673_v31 = vmul.f32 %v1260_v17, %v1260_v17  ;;  %v3685_v14 = vmul.f32 %v1262_v19, %v1262_v19 }
 0x161   :  { %v3675_v54 = vmul.f32 %v1263_v13, %v1263_v13  ;;  %v3677_v55 = vmul.f32 %v1265_v51, %v1265_v51  ;;  %2148 = vmatmul.mubr.bf16.gmra.mrb[132].mxu1 %v1727_v20  ;;  %2437 = vmatmul.mubr.bf16.gmra.mrb[132].mxu0 %v1729_v21 }
 0x162   :  { %v3687_v18 = vmul.f32 %v1264_v27, %v1264_v27  ;;  %v3689_v22 = vmul.f32 %v1266_v28, %v1266_v28  ;;  %2155 = vmatprep.mubr.bf16.mxu1 %v1732_v63  ;;  %2444 = vmatprep.mubr.bf16.mxu0 %v1734_v1 }
 0x163   :  { %v1747_v10 = vpack.c.bf16 %v3675_v54, %v3669_v25  ;;  %v1749_v11 = vpack.c.bf16 %v3677_v55, %v3671_v26 }
 0x164   :  { %v1748_v15 = vpack.c.bf16 %v3687_v18, %v3673_v31  ;;  %v1750_v16 = vpack.c.bf16 %v3689_v22, %v3685_v14  ;;  %v609_v20 = vpop.f32.mrb[28].mxu0  ;;  %v962_v21 = vpop.f32.mrb[28].mxu1 }
 0x165   :  { %v1267_v43 = vmax.f32 %v609_v20, 0.0  ;;  %v1269_v59 = vmax.f32 %v962_v21, 0.0  ;;  %v611_v63 = vpop.f32.mrb[29].mxu0  ;;  %v964_v41 = vpop.f32.mrb[29].mxu1 }
 0x166   :  { %v1268_v58 = vmax.f32 %v611_v63, 0.0  ;;  %v1270_v60 = vmax.f32 %v964_v41, 0.0  ;;  %v613_v1 = vpop.f32.mrb[30].mxu0  ;;  %v966_v17 = vpop.f32.mrb[30].mxu1  ;;  %v4675_v63 = vpack.c.bf16 %v3559_v47, %v3553_v40 }
 0x167   :  { %v1271_v19 = vmax.f32 %v613_v1, 0.0  ;;  %v1273_v23 = vmax.f32 %v966_v17, 0.0  ;;  %v615_v3 = vpop.f32.mrb[31].mxu0  ;;  %v968_v13 = vpop.f32.mrb[31].mxu1  ;;  %v3705_v51 = vmul.f32 %v1267_v43, %v1267_v43  ;;  %v3707_v53 = vmul.f32 %v1269_v59, %v1269_v59 }
 0x168   :  { %v1272_v57 = vmax.f32 %v615_v3, 0.0  ;;  %v1274_v27 = vmax.f32 %v968_v13, 0.0  ;;  %v3709_v28 = vmul.f32 %v1268_v58, %v1268_v58  ;;  %v3721_v43 = vmul.f32 %v1270_v60, %v1270_v60 }
 0x169   :  { %v3711_v20 = vmul.f32 %v1271_v19, %v1271_v19  ;;  %v3713_v21 = vmul.f32 %v1273_v23, %v1273_v23  ;;  %2156 = vmatmul.mubr.bf16.gmra.mrb[136].mxu1 %v1731_v61  ;;  %2445 = vmatmul.mubr.bf16.gmra.mrb[136].mxu0 %v4675_v63  ;;  %v4676_v58 = vpack.c.bf16 %v3589_v37, %v3581_v33 }
 0x16a   :  { %v3723_v59 = vmul.f32 %v1272_v57, %v1272_v57  ;;  %v3725_v41 = vmul.f32 %v1274_v27, %v1274_v27  ;;  %v4677_v1 = vpack.c.bf16 %v3591_v38, %v3587_v36 }
 0x16b   :  { %2163 = vmatprep.mubr.bf16.mxu1 %v4676_v58 }
 0x16c   :  { %2452 = vmatprep.mubr.bf16.mxu0 %v4677_v1  ;;  %v1752_v46 = vpack.c.bf16 %v3723_v59, %v3709_v28  ;;  %v619_v61 = vpop.f32.mrb[32].mxu0  ;;  %v972_v60 = vpop.f32.mrb[32].mxu1 }
 0x16d   :  { %v1275_v33 = vmax.f32 %v619_v61, 0.0  ;;  %v1277_v37 = vmax.f32 %v972_v60, 0.0  ;;  %v621_v17 = vpop.f32.mrb[33].mxu0  ;;  %v974_v19 = vpop.f32.mrb[33].mxu1 }
 0x16e   :  { %v1276_v36 = vmax.f32 %v621_v17, 0.0  ;;  %v1278_v38 = vmax.f32 %v974_v19, 0.0  ;;  %v623_v23 = vpop.f32.mrb[34].mxu0  ;;  %v976_v3 = vpop.f32.mrb[34].mxu1  ;;  %v4678_v17 = vpack.c.bf16 %v3583_v34, %v3577_v29  ;;  %v4679_v19 = vpack.c.bf16 %v3585_v35, %v3579_v30 }
 0x16f   :  { %v1279_v13 = vmax.f32 %v623_v23, 0.0  ;;  %v1281_v57 = vmax.f32 %v976_v3, 0.0  ;;  %v625_v27 = vpop.f32.mrb[35].mxu0  ;;  %v978_v63 = vpop.f32.mrb[35].mxu1  ;;  %v3741_v58 = vmul.f32 %v1275_v33, %v1275_v33  ;;  %v3743_v1 = vmul.f32 %v1277_v37, %v1277_v37 }
 0x170   :  { %v1280_v40 = vmax.f32 %v625_v27, 0.0  ;;  %v1282_v39 = vmax.f32 %v978_v63, 0.0  ;;  %v3745_v47 = vmul.f32 %v1276_v36, %v1276_v36  ;;  %v3757_v33 = vmul.f32 %v1278_v38, %v1278_v38 }
 0x171   :  { %v3747_v61 = vmul.f32 %v1279_v13, %v1279_v13  ;;  %v3749_v60 = vmul.f32 %v1281_v57, %v1281_v57  ;;  %2164 = vmatmul.mubr.bf16.gmra.mrb[140].mxu1 %v4678_v17  ;;  %2453 = vmatmul.mubr.bf16.gmra.mrb[140].mxu0 %v4679_v19  ;;  %v4680_v36 = vpack.c.bf16 %v3615_v9, %v3607_v2 }
 0x172   :  { %v3759_v37 = vmul.f32 %v1280_v40, %v1280_v40  ;;  %v3761_v23 = vmul.f32 %v1282_v39, %v1282_v39  ;;  %v4681_v3 = vpack.c.bf16 %v3617_v24, %v3613_v8 }
 0x173   :  { %2171 = vmatprep.mubr.bf16.mxu1 %v4680_v36 }
 0x174   :  { %2460 = vmatprep.mubr.bf16.mxu0 %v4681_v3  ;;  %v629_v39 = vpop.f32.mrb[36].mxu0  ;;  %v982_v40 = vpop.f32.mrb[36].mxu1 }
 0x175   :  { %v1283_v2 = vmax.f32 %v629_v39, 0.0  ;;  %v1285_v9 = vmax.f32 %v982_v40, 0.0  ;;  %v631_v38 = vpop.f32.mrb[37].mxu0  ;;  %v984_v13 = vpop.f32.mrb[37].mxu1 }
 0x176   :  { %v1284_v8 = vmax.f32 %v631_v38, 0.0  ;;  %v1286_v24 = vmax.f32 %v984_v13, 0.0  ;;  %v633_v57 = vpop.f32.mrb[38].mxu0  ;;  %v986_v27 = vpop.f32.mrb[38].mxu1  ;;  %v4682_v38 = vpack.c.bf16 %v3609_v4, %v3603_v32  ;;  %v4683_v13 = vpack.c.bf16 %v3611_v5, %v3605_v42 }
 0x177   :  { %v1287_v63 = vmax.f32 %v633_v57, 0.0  ;;  %v1289_v17 = vmax.f32 %v986_v27, 0.0  ;;  %v635_v19 = vpop.f32.mrb[39].mxu0  ;;  %v988_v36 = vpop.f32.mrb[39].mxu1  ;;  %v3777_v3 = vmul.f32 %v1283_v2, %v1283_v2  ;;  %v3779_v30 = vmul.f32 %v1285_v9, %v1285_v9 }
 0x178   :  { %v1288_v29 = vmax.f32 %v635_v19, 0.0  ;;  %v1290_v35 = vmax.f32 %v988_v36, 0.0  ;;  %v3781_v34 = vmul.f32 %v1284_v8, %v1284_v8  ;;  %v3793_v2 = vmul.f32 %v1286_v24, %v1286_v24 }
 0x179   :  { %v3783_v39 = vmul.f32 %v1287_v63, %v1287_v63  ;;  %v3785_v40 = vmul.f32 %v1289_v17, %v1289_v17  ;;  %2172 = vmatmul.mubr.bf16.gmra.mrb[144].mxu1 %v4682_v38  ;;  %2461 = vmatmul.mubr.bf16.gmra.mrb[144].mxu0 %v4683_v13 }
 0x17a   :  { %v3795_v9 = vmul.f32 %v1288_v29, %v1288_v29  ;;  %v3797_v57 = vmul.f32 %v1290_v35, %v1290_v35  ;;  %2179 = vmatprep.mubr.bf16.mxu1 %v1744_v49  ;;  %2468 = vmatprep.mubr.bf16.mxu0 %v1746_v50 }
 0x17c   :  { %v1760_v4 = vpack.c.bf16 %v3795_v9, %v3781_v34  ;;  %v1762_v5 = vpack.c.bf16 %v3797_v57, %v3793_v2  ;;  %v639_v29 = vpop.f32.mrb[40].mxu0  ;;  %v992_v35 = vpop.f32.mrb[40].mxu1 }
 0x17d   :  { %v1291_v62 = vmax.f32 %v639_v29, 0.0  ;;  %v1293_v52 = vmax.f32 %v992_v35, 0.0  ;;  %v641_v49 = vpop.f32.mrb[41].mxu0  ;;  %v994_v8 = vpop.f32.mrb[41].mxu1 }
 0x17e   :  { %v1292_v48 = vmax.f32 %v641_v49, 0.0  ;;  %v1294_v56 = vmax.f32 %v994_v8, 0.0  ;;  %v643_v50 = vpop.f32.mrb[42].mxu0  ;;  %v996_v24 = vpop.f32.mrb[42].mxu1 }
 0x17f   :  { %v1295_v27 = vmax.f32 %v643_v50, 0.0  ;;  %v1297_v63 = vmax.f32 %v996_v24, 0.0  ;;  %v645_v17 = vpop.f32.mrb[43].mxu0  ;;  %v998_v19 = vpop.f32.mrb[43].mxu1  ;;  %v3813_v36 = vmul.f32 %v1291_v62, %v1291_v62  ;;  %v3815_v38 = vmul.f32 %v1293_v52, %v1293_v52 }
 0x180   :  { %v1296_v13 = vmax.f32 %v645_v17, 0.0  ;;  %v1298_v42 = vmax.f32 %v998_v19, 0.0  ;;  %v3817_v32 = vmul.f32 %v1292_v48, %v1292_v48  ;;  %v3829_v62 = vmul.f32 %v1294_v56, %v1294_v56 }
 0x181   :  { %v3819_v29 = vmul.f32 %v1295_v27, %v1295_v27  ;;  %v3821_v35 = vmul.f32 %v1297_v63, %v1297_v63  ;;  %2180 = vmatmul.mubr.bf16.gmra.mrb[148].mxu1 %v1743_v44  ;;  %2469 = vmatmul.mubr.bf16.gmra.mrb[148].mxu0 %v1745_v45 }
 0x182   :  { %v3831_v52 = vmul.f32 %v1296_v13, %v1296_v13  ;;  %v3833_v49 = vmul.f32 %v1298_v42, %v1298_v42  ;;  %2187 = vmatprep.mubr.bf16.mxu1 %v1748_v15  ;;  %2476 = vmatprep.mubr.bf16.mxu0 %v1750_v16 }
 0x183   :  { %v1763_v7 = vpack.c.bf16 %v3819_v29, %v3813_v36  ;;  %v1765_v6 = vpack.c.bf16 %v3821_v35, %v3815_v38 }
 0x184   :  { %v1764_v12 = vpack.c.bf16 %v3831_v52, %v3817_v32  ;;  %v1766_v0 = vpack.c.bf16 %v3833_v49, %v3829_v62  ;;  %v649_v44 = vpop.f32.mrb[44].mxu0  ;;  %v1002_v45 = vpop.f32.mrb[44].mxu1 }
 0x185   :  { %v1299_v31 = vmax.f32 %v649_v44, 0.0  ;;  %v1301_v18 = vmax.f32 %v1002_v45, 0.0  ;;  %v651_v15 = vpop.f32.mrb[45].mxu0  ;;  %v1004_v42 = vpop.f32.mrb[45].mxu1 }
 0x186   :  { %v1300_v14 = vmax.f32 %v651_v15, 0.0  ;;  %v1302_v22 = vmax.f32 %v1004_v42, 0.0  ;;  %v653_v16 = vpop.f32.mrb[46].mxu0  ;;  %v1006_v8 = vpop.f32.mrb[46].mxu1  ;;  %v4684_v42 = vpack.c.bf16 %v3725_v41, %v3721_v43 }
 0x187   :  { %v1303_v48 = vmax.f32 %v653_v16, 0.0  ;;  %v1305_v56 = vmax.f32 %v1006_v8, 0.0  ;;  %v655_v50 = vpop.f32.mrb[47].mxu0  ;;  %v1008_v24 = vpop.f32.mrb[47].mxu1  ;;  %v3849_v27 = vmul.f32 %v1299_v31, %v1299_v31  ;;  %v3851_v63 = vmul.f32 %v1301_v18, %v1301_v18 }
 0x188   :  { %v1304_v17 = vmax.f32 %v655_v50, 0.0  ;;  %v1306_v19 = vmax.f32 %v1008_v24, 0.0  ;;  %v3853_v13 = vmul.f32 %v1300_v14, %v1300_v14  ;;  %v3865_v31 = vmul.f32 %v1302_v22, %v1302_v22 }
 0x189   :  { %v3855_v44 = vmul.f32 %v1303_v48, %v1303_v48  ;;  %v3857_v45 = vmul.f32 %v1305_v56, %v1305_v56  ;;  %2188 = vmatmul.mubr.bf16.gmra.mrb[152].mxu1 %v1747_v10  ;;  %2477 = vmatmul.mubr.bf16.gmra.mrb[152].mxu0 %v1749_v11 }
 0x18a   :  { %v3867_v18 = vmul.f32 %v1304_v17, %v1304_v17  ;;  %v3869_v15 = vmul.f32 %v1306_v19, %v1306_v19  ;;  %2195 = vmatprep.mubr.bf16.mxu1 %v1752_v46  ;;  %2484 = vmatprep.mubr.bf16.mxu0 %v4684_v42 }
 0x18b   :  { %v1767_v25 = vpack.c.bf16 %v3855_v44, %v3849_v27 }
 0x18c   :  { %v1768_v54 = vpack.c.bf16 %v3867_v18, %v3853_v13  ;;  %v1770_v55 = vpack.c.bf16 %v3869_v15, %v3865_v31  ;;  %v659_v10 = vpop.f32.mrb[48].mxu0  ;;  %v1012_v11 = vpop.f32.mrb[48].mxu1 }
 0x18d   :  { %v1307_v28 = vmax.f32 %v659_v10, 0.0  ;;  %v1309_v59 = vmax.f32 %v1012_v11, 0.0  ;;  %v661_v46 = vpop.f32.mrb[49].mxu0  ;;  %v1014_v14 = vpop.f32.mrb[49].mxu1 }
 0x18e   :  { %v1308_v43 = vmax.f32 %v661_v46, 0.0  ;;  %v1310_v41 = vmax.f32 %v1014_v14, 0.0  ;;  %v663_v22 = vpop.f32.mrb[50].mxu0  ;;  %v1016_v16 = vpop.f32.mrb[50].mxu1  ;;  %v4685_v46 = vpack.c.bf16 %v3711_v20, %v3705_v51  ;;  %v4686_v14 = vpack.c.bf16 %v3713_v21, %v3707_v53 }
 0x18f   :  { %v1311_v8 = vmax.f32 %v663_v22, 0.0  ;;  %v1313_v48 = vmax.f32 %v1016_v16, 0.0  ;;  %v665_v56 = vpop.f32.mrb[51].mxu0  ;;  %v1018_v50 = vpop.f32.mrb[51].mxu1  ;;  %v3885_v24 = vmul.f32 %v1307_v28, %v1307_v28  ;;  %v3887_v17 = vmul.f32 %v1309_v59, %v1309_v59 }
 0x190   :  { %v1312_v19 = vmax.f32 %v665_v56, 0.0  ;;  %v1314_v42 = vmax.f32 %v1018_v50, 0.0  ;;  %v3889_v26 = vmul.f32 %v1308_v43, %v1308_v43  ;;  %v3901_v28 = vmul.f32 %v1310_v41, %v1310_v41 }
 0x191   :  { %v3891_v10 = vmul.f32 %v1311_v8, %v1311_v8  ;;  %v3893_v11 = vmul.f32 %v1313_v48, %v1313_v48  ;;  %2196 = vmatmul.mubr.bf16.gmra.mrb[156].mxu1 %v4685_v46  ;;  %2485 = vmatmul.mubr.bf16.gmra.mrb[156].mxu0 %v4686_v14  ;;  %v4687_v43 = vpack.c.bf16 %v3759_v37, %v3745_v47 }
 0x192   :  { %v3903_v59 = vmul.f32 %v1312_v19, %v1312_v19  ;;  %v3905_v22 = vmul.f32 %v1314_v42, %v1314_v42  ;;  %v4688_v16 = vpack.c.bf16 %v3761_v23, %v3757_v33 }
 0x193   :  { %2203 = vmatprep.mubr.bf16.mxu1 %v4687_v43 }
 0x194   :  { %2492 = vmatprep.mubr.bf16.mxu0 %v4688_v16  ;;  %v669_v41 = vpop.f32.mrb[52].mxu0  ;;  %v1022_v8 = vpop.f32.mrb[52].mxu1 }
 0x195   :  { %v1315_v47 = vmax.f32 %v669_v41, 0.0  ;;  %v1317_v37 = vmax.f32 %v1022_v8, 0.0  ;;  %v671_v48 = vpop.f32.mrb[53].mxu0  ;;  %v1024_v56 = vpop.f32.mrb[53].mxu1 }
 0x196   :  { %v1316_v33 = vmax.f32 %v671_v48, 0.0  ;;  %v1318_v23 = vmax.f32 %v1024_v56, 0.0  ;;  %v673_v50 = vpop.f32.mrb[54].mxu0  ;;  %v1026_v19 = vpop.f32.mrb[54].mxu1  ;;  %v4689_v48 = vpack.c.bf16 %v3747_v61, %v3741_v58  ;;  %v4690_v56 = vpack.c.bf16 %v3749_v60, %v3743_v1 }
 0x197   :  { %v1319_v42 = vmax.f32 %v673_v50, 0.0  ;;  %v1321_v46 = vmax.f32 %v1026_v19, 0.0  ;;  %v675_v14 = vpop.f32.mrb[55].mxu0  ;;  %v1028_v43 = vpop.f32.mrb[55].mxu1  ;;  %v3921_v16 = vmul.f32 %v1315_v47, %v1315_v47  ;;  %v3923_v53 = vmul.f32 %v1317_v37, %v1317_v37 }
 0x198   :  { %v1320_v51 = vmax.f32 %v675_v14, 0.0  ;;  %v1322_v21 = vmax.f32 %v1028_v43, 0.0  ;;  %v3925_v20 = vmul.f32 %v1316_v33, %v1316_v33  ;;  %v3937_v47 = vmul.f32 %v1318_v23, %v1318_v23 }
 0x199   :  { %v3927_v41 = vmul.f32 %v1319_v42, %v1319_v42  ;;  %v3929_v8 = vmul.f32 %v1321_v46, %v1321_v46  ;;  %2204 = vmatmul.mubr.bf16.gmra.mrb[160].mxu1 %v4689_v48  ;;  %2493 = vmatmul.mubr.bf16.gmra.mrb[160].mxu0 %v4690_v56 }
 0x19a   :  { %v3939_v37 = vmul.f32 %v1320_v51, %v1320_v51  ;;  %v3941_v50 = vmul.f32 %v1322_v21, %v1322_v21  ;;  %2211 = vmatprep.mubr.bf16.mxu1 %v1760_v4  ;;  %2500 = vmatprep.mubr.bf16.mxu0 %v1762_v5 }
 0x19c   :  { %v1776_v61 = vpack.c.bf16 %v3939_v37, %v3925_v20  ;;  %v1778_v60 = vpack.c.bf16 %v3941_v50, %v3937_v47  ;;  %v679_v51 = vpop.f32.mrb[56].mxu0  ;;  %v1032_v21 = vpop.f32.mrb[56].mxu1 }
 0x19d   :  { %v1323_v34 = vmax.f32 %v679_v51, 0.0  ;;  %v1325_v9 = vmax.f32 %v1032_v21, 0.0  ;;  %v681_v4 = vpop.f32.mrb[57].mxu0  ;;  %v1034_v33 = vpop.f32.mrb[57].mxu1 }
 0x19e   :  { %v1324_v2 = vmax.f32 %v681_v4, 0.0  ;;  %v1326_v57 = vmax.f32 %v1034_v33, 0.0  ;;  %v683_v5 = vpop.f32.mrb[58].mxu0  ;;  %v1036_v23 = vpop.f32.mrb[58].mxu1  ;;  %v4691_v4 = vpack.c.bf16 %v3783_v39, %v3777_v3  ;;  %v4692_v33 = vpack.c.bf16 %v3785_v40, %v3779_v30 }
 0x19f   :  { %v1327_v19 = vmax.f32 %v683_v5, 0.0  ;;  %v1329_v42 = vmax.f32 %v1036_v23, 0.0  ;;  %v685_v46 = vpop.f32.mrb[59].mxu0  ;;  %v1038_v14 = vpop.f32.mrb[59].mxu1  ;;  %v3957_v43 = vmul.f32 %v1323_v34, %v1323_v34  ;;  %v3959_v48 = vmul.f32 %v1325_v9, %v1325_v9 }
 0x1a0   :  { %v1328_v56 = vmax.f32 %v685_v46, 0.0  ;;  %v1330_v1 = vmax.f32 %v1038_v14, 0.0  ;;  %v3961_v58 = vmul.f32 %v1324_v2, %v1324_v2  ;;  %v3973_v34 = vmul.f32 %v1326_v57, %v1326_v57 }
 0x1a1   :  { %v3963_v51 = vmul.f32 %v1327_v19, %v1327_v19  ;;  %v3965_v21 = vmul.f32 %v1329_v42, %v1329_v42  ;;  %2212 = vmatmul.mubr.bf16.gmra.mrb[164].mxu1 %v4691_v4  ;;  %2501 = vmatmul.mubr.bf16.gmra.mrb[164].mxu0 %v4692_v33 }
 0x1a2   :  { %v3975_v9 = vmul.f32 %v1328_v56, %v1328_v56  ;;  %v3977_v5 = vmul.f32 %v1330_v1, %v1330_v1  ;;  %2219 = vmatprep.mubr.bf16.mxu1 %v1764_v12  ;;  %2508 = vmatprep.mubr.bf16.mxu0 %v1766_v0 }
 0x1a4   :  { %v1780_v39 = vpack.c.bf16 %v3975_v9, %v3961_v58  ;;  %v1782_v40 = vpack.c.bf16 %v3977_v5, %v3973_v34  ;;  %v689_v1 = vpop.f32.mrb[60].mxu0  ;;  %v1042_v2 = vpop.f32.mrb[60].mxu1 }
 0x1a5   :  { %v1331_v32 = vmax.f32 %v689_v1, 0.0  ;;  %v1333_v52 = vmax.f32 %v1042_v2, 0.0  ;;  %v691_v12 = vpop.f32.mrb[61].mxu0  ;;  %v1044_v57 = vpop.f32.mrb[61].mxu1 }
 0x1a6   :  { %v1332_v62 = vmax.f32 %v691_v12, 0.0  ;;  %v1334_v49 = vmax.f32 %v1044_v57, 0.0  ;;  %v693_v0 = vpop.f32.mrb[62].mxu0  ;;  %v1046_v23 = vpop.f32.mrb[62].mxu1 }
 0x1a7   :  { %v1335_v19 = vmax.f32 %v693_v0, 0.0  ;;  %v1337_v42 = vmax.f32 %v1046_v23, 0.0  ;;  %v695_v46 = vpop.f32.mrb[63].mxu0  ;;  %v1048_v14 = vpop.f32.mrb[63].mxu1  ;;  %v3993_v56 = vmul.f32 %v1331_v32, %v1331_v32  ;;  %v3995_v4 = vmul.f32 %v1333_v52, %v1333_v52 }
 0x1a8   :  { %v1336_v33 = vmax.f32 %v695_v46, 0.0  ;;  %v1338_v30 = vmax.f32 %v1048_v14, 0.0  ;;  %v3997_v3 = vmul.f32 %v1332_v62, %v1332_v62  ;;  %v4009_v32 = vmul.f32 %v1334_v49, %v1334_v49 }
 0x1a9   :  { %v3999_v1 = vmul.f32 %v1335_v19, %v1335_v19  ;;  %v4001_v2 = vmul.f32 %v1337_v42, %v1337_v42  ;;  %2220 = vmatmul.mubr.bf16.gmra.mrb[168].mxu1 %v1763_v7  ;;  %2509 = vmatmul.mubr.bf16.gmra.mrb[168].mxu0 %v1765_v6 }
 0x1aa   :  { %v4011_v52 = vmul.f32 %v1336_v33, %v1336_v33  ;;  %v4013_v12 = vmul.f32 %v1338_v30, %v1338_v30  ;;  %2227 = vmatprep.mubr.bf16.mxu1 %v1768_v54  ;;  %2516 = vmatprep.mubr.bf16.mxu0 %v1770_v55 }
 0x1ab   :  { %v1783_v36 = vpack.c.bf16 %v3999_v1, %v3993_v56  ;;  %v1785_v38 = vpack.c.bf16 %v4001_v2, %v3995_v4 }
 0x1ac   :  { %v1784_v29 = vpack.c.bf16 %v4011_v52, %v3997_v3  ;;  %v1786_v35 = vpack.c.bf16 %v4013_v12, %v4009_v32  ;;  %v699_v7 = vpop.f32.mrb[64].mxu0  ;;  %v1052_v6 = vpop.f32.mrb[64].mxu1 }
 0x1ad   :  { %v1339_v13 = vmax.f32 %v699_v7, 0.0  ;;  %v1341_v18 = vmax.f32 %v1052_v6, 0.0  ;;  %v701_v54 = vpop.f32.mrb[65].mxu0  ;;  %v1054_v30 = vpop.f32.mrb[65].mxu1 }
 0x1ae   :  { %v1340_v31 = vmax.f32 %v701_v54, 0.0  ;;  %v1342_v15 = vmax.f32 %v1054_v30, 0.0  ;;  %v703_v55 = vpop.f32.mrb[66].mxu0  ;;  %v1056_v57 = vpop.f32.mrb[66].mxu1  ;;  %v4693_v54 = vpack.c.bf16 %v3857_v45, %v3851_v63 }
 0x1af   :  { %v1343_v62 = vmax.f32 %v703_v55, 0.0  ;;  %v1345_v49 = vmax.f32 %v1056_v57, 0.0  ;;  %v705_v0 = vpop.f32.mrb[67].mxu0  ;;  %v1058_v23 = vpop.f32.mrb[67].mxu1  ;;  %v4029_v19 = vmul.f32 %v1339_v13, %v1339_v13  ;;  %v4031_v42 = vmul.f32 %v1341_v18, %v1341_v18 }
 0x1b0   :  { %v1344_v46 = vmax.f32 %v705_v0, 0.0  ;;  %v1346_v14 = vmax.f32 %v1058_v23, 0.0  ;;  %v4033_v33 = vmul.f32 %v1340_v31, %v1340_v31  ;;  %v4045_v13 = vmul.f32 %v1342_v15, %v1342_v15 }
 0x1b1   :  { %v4035_v7 = vmul.f32 %v1343_v62, %v1343_v62  ;;  %v4037_v6 = vmul.f32 %v1345_v49, %v1345_v49  ;;  %2228 = vmatmul.mubr.bf16.gmra.mrb[172].mxu1 %v1767_v25  ;;  %2517 = vmatmul.mubr.bf16.gmra.mrb[172].mxu0 %v4693_v54  ;;  %v4694_v31 = vpack.c.bf16 %v3903_v59, %v3889_v26 }
 0x1b2   :  { %v4047_v18 = vmul.f32 %v1344_v46, %v1344_v46  ;;  %v4049_v30 = vmul.f32 %v1346_v14, %v1346_v14  ;;  %v4695_v55 = vpack.c.bf16 %v3905_v22, %v3901_v28 }
 0x1b3   :  { %2235 = vmatprep.mubr.bf16.mxu1 %v4694_v31 }
 0x1b4   :  { %2524 = vmatprep.mubr.bf16.mxu0 %v4695_v55  ;;  %v1788_v44 = vpack.c.bf16 %v4047_v18, %v4033_v33  ;;  %v709_v25 = vpop.f32.mrb[68].mxu0  ;;  %v1062_v15 = vpop.f32.mrb[68].mxu1 }
 0x1b5   :  { %v1347_v26 = vmax.f32 %v709_v25, 0.0  ;;  %v1349_v59 = vmax.f32 %v1062_v15, 0.0  ;;  %v711_v57 = vpop.f32.mrb[69].mxu0  ;;  %v1064_v62 = vpop.f32.mrb[69].mxu1 }
 0x1b6   :  { %v1348_v28 = vmax.f32 %v711_v57, 0.0  ;;  %v1350_v22 = vmax.f32 %v1064_v62, 0.0  ;;  %v713_v49 = vpop.f32.mrb[70].mxu0  ;;  %v1066_v0 = vpop.f32.mrb[70].mxu1  ;;  %v4696_v57 = vpack.c.bf16 %v3891_v10, %v3885_v24  ;;  %v4697_v62 = vpack.c.bf16 %v3893_v11, %v3887_v17 }
 0x1b7   :  { %v1351_v23 = vmax.f32 %v713_v49, 0.0  ;;  %v1353_v46 = vmax.f32 %v1066_v0, 0.0  ;;  %v715_v14 = vpop.f32.mrb[71].mxu0  ;;  %v1068_v54 = vpop.f32.mrb[71].mxu1  ;;  %v4065_v31 = vmul.f32 %v1347_v26, %v1347_v26  ;;  %v4067_v55 = vmul.f32 %v1349_v59, %v1349_v59 }
 0x1b8   :  { %v1352_v63 = vmax.f32 %v715_v14, 0.0  ;;  %v1354_v27 = vmax.f32 %v1068_v54, 0.0  ;;  %v4069_v45 = vmul.f32 %v1348_v28, %v1348_v28  ;;  %v4081_v26 = vmul.f32 %v1350_v22, %v1350_v22 }
 0x1b9   :  { %v4071_v25 = vmul.f32 %v1351_v23, %v1351_v23  ;;  %v4073_v15 = vmul.f32 %v1353_v46, %v1353_v46  ;;  %2236 = vmatmul.mubr.bf16.gmra.mrb[176].mxu1 %v4696_v57  ;;  %2525 = vmatmul.mubr.bf16.gmra.mrb[176].mxu0 %v4697_v62 }
 0x1ba   :  { %v4083_v59 = vmul.f32 %v1352_v63, %v1352_v63  ;;  %v4085_v49 = vmul.f32 %v1354_v27, %v1354_v27  ;;  %2243 = vmatprep.mubr.bf16.mxu1 %v1776_v61  ;;  %2532 = vmatprep.mubr.bf16.mxu0 %v1778_v60 }
 0x1bc   :  { %v1792_v10 = vpack.c.bf16 %v4083_v59, %v4069_v45  ;;  %v1794_v11 = vpack.c.bf16 %v4085_v49, %v4081_v26  ;;  %v719_v27 = vpop.f32.mrb[72].mxu0  ;;  %v1072_v63 = vpop.f32.mrb[72].mxu1 }
 0x1bd   :  { %v1355_v20 = vmax.f32 %v719_v27, 0.0  ;;  %v1357_v37 = vmax.f32 %v1072_v63, 0.0  ;;  %v721_v61 = vpop.f32.mrb[73].mxu0  ;;  %v1074_v28 = vpop.f32.mrb[73].mxu1 }
 0x1be   :  { %v1356_v47 = vmax.f32 %v721_v61, 0.0  ;;  %v1358_v50 = vmax.f32 %v1074_v28, 0.0  ;;  %v723_v60 = vpop.f32.mrb[74].mxu0  ;;  %v1076_v22 = vpop.f32.mrb[74].mxu1  ;;  %v4698_v61 = vpack.c.bf16 %v3927_v41, %v3921_v16  ;;  %v4699_v28 = vpack.c.bf16 %v3929_v8, %v3923_v53 }
 0x1bf   :  { %v1359_v0 = vmax.f32 %v723_v60, 0.0  ;;  %v1361_v23 = vmax.f32 %v1076_v22, 0.0  ;;  %v725_v46 = vpop.f32.mrb[75].mxu0  ;;  %v1078_v14 = vpop.f32.mrb[75].mxu1  ;;  %v4101_v54 = vmul.f32 %v1355_v20, %v1355_v20  ;;  %v4103_v57 = vmul.f32 %v1357_v37, %v1357_v37 }
 0x1c0   :  { %v1360_v62 = vmax.f32 %v725_v46, 0.0  ;;  %v1362_v17 = vmax.f32 %v1078_v14, 0.0  ;;  %v4105_v24 = vmul.f32 %v1356_v47, %v1356_v47  ;;  %v4117_v20 = vmul.f32 %v1358_v50, %v1358_v50 }
 0x1c1   :  { %v4107_v27 = vmul.f32 %v1359_v0, %v1359_v0  ;;  %v4109_v63 = vmul.f32 %v1361_v23, %v1361_v23  ;;  %2244 = vmatmul.mubr.bf16.gmra.mrb[180].mxu1 %v4698_v61  ;;  %2533 = vmatmul.mubr.bf16.gmra.mrb[180].mxu0 %v4699_v28 }
 0x1c2   :  { %v4119_v37 = vmul.f32 %v1360_v62, %v1360_v62  ;;  %v4121_v60 = vmul.f32 %v1362_v17, %v1362_v17  ;;  %2251 = vmatprep.mubr.bf16.mxu1 %v1780_v39  ;;  %2540 = vmatprep.mubr.bf16.mxu0 %v1782_v40 }
 0x1c4   :  { %v1796_v41 = vpack.c.bf16 %v4119_v37, %v4105_v24  ;;  %v1798_v8 = vpack.c.bf16 %v4121_v60, %v4117_v20  ;;  %v729_v17 = vpop.f32.mrb[76].mxu0  ;;  %v1082_v47 = vpop.f32.mrb[76].mxu1 }
 0x1c5   :  { %v1363_v58 = vmax.f32 %v729_v17, 0.0  ;;  %v1365_v9 = vmax.f32 %v1082_v47, 0.0  ;;  %v731_v39 = vpop.f32.mrb[77].mxu0  ;;  %v1084_v50 = vpop.f32.mrb[77].mxu1 }
 0x1c6   :  { %v1364_v34 = vmax.f32 %v731_v39, 0.0  ;;  %v1366_v5 = vmax.f32 %v1084_v50, 0.0  ;;  %v733_v40 = vpop.f32.mrb[78].mxu0  ;;  %v1086_v22 = vpop.f32.mrb[78].mxu1  ;;  %v4700_v39 = vpack.c.bf16 %v3963_v51, %v3957_v43  ;;  %v4701_v50 = vpack.c.bf16 %v3965_v21, %v3959_v48 }
 0x1c7   :  { %v1367_v0 = vmax.f32 %v733_v40, 0.0  ;;  %v1369_v23 = vmax.f32 %v1086_v22, 0.0  ;;  %v735_v46 = vpop.f32.mrb[79].mxu0  ;;  %v1088_v14 = vpop.f32.mrb[79].mxu1  ;;  %v4137_v62 = vmul.f32 %v1363_v58, %v1363_v58  ;;  %v4139_v61 = vmul.f32 %v1365_v9, %v1365_v9 }
 0x1c8   :  { %v1368_v28 = vmax.f32 %v735_v46, 0.0  ;;  %v1370_v53 = vmax.f32 %v1088_v14, 0.0  ;;  %v4141_v16 = vmul.f32 %v1364_v34, %v1364_v34  ;;  %v4153_v58 = vmul.f32 %v1366_v5, %v1366_v5 }
 0x1c9   :  { %v4143_v17 = vmul.f32 %v1367_v0, %v1367_v0  ;;  %v4145_v47 = vmul.f32 %v1369_v23, %v1369_v23  ;;  %2252 = vmatmul.mubr.bf16.gmra.mrb[184].mxu1 %v4700_v39  ;;  %2541 = vmatmul.mubr.bf16.gmra.mrb[184].mxu0 %v4701_v50 }
 0x1ca   :  { %v4155_v9 = vmul.f32 %v1368_v28, %v1368_v28  ;;  %v4157_v40 = vmul.f32 %v1370_v53, %v1370_v53  ;;  %2259 = vmatprep.mubr.bf16.mxu1 %v1784_v29  ;;  %2548 = vmatprep.mubr.bf16.mxu0 %v1786_v35 }
 0x1cc   :  { %v1800_v51 = vpack.c.bf16 %v4155_v9, %v4141_v16  ;;  %v1802_v21 = vpack.c.bf16 %v4157_v40, %v4153_v58  ;;  %v739_v53 = vpop.f32.mrb[80].mxu0  ;;  %v1092_v34 = vpop.f32.mrb[80].mxu1 }
 0x1cd   :  { %v1371_v3 = vmax.f32 %v739_v53, 0.0  ;;  %v1373_v52 = vmax.f32 %v1092_v34, 0.0  ;;  %v741_v29 = vpop.f32.mrb[81].mxu0  ;;  %v1094_v5 = vpop.f32.mrb[81].mxu1 }
 0x1ce   :  { %v1372_v32 = vmax.f32 %v741_v29, 0.0  ;;  %v1374_v12 = vmax.f32 %v1094_v5, 0.0  ;;  %v743_v35 = vpop.f32.mrb[82].mxu0  ;;  %v1096_v22 = vpop.f32.mrb[82].mxu1  ;;  %v4702_v5 = vpack.c.bf16 %v4049_v30, %v4045_v13 }
 0x1cf   :  { %v1375_v0 = vmax.f32 %v743_v35, 0.0  ;;  %v1377_v23 = vmax.f32 %v1096_v22, 0.0  ;;  %v745_v46 = vpop.f32.mrb[83].mxu0  ;;  %v1098_v14 = vpop.f32.mrb[83].mxu1  ;;  %v4173_v28 = vmul.f32 %v1371_v3, %v1371_v3  ;;  %v4175_v39 = vmul.f32 %v1373_v52, %v1373_v52 }
 0x1d0   :  { %v1376_v50 = vmax.f32 %v745_v46, 0.0  ;;  %v1378_v48 = vmax.f32 %v1098_v14, 0.0  ;;  %v4177_v43 = vmul.f32 %v1372_v32, %v1372_v32  ;;  %v4189_v3 = vmul.f32 %v1374_v12, %v1374_v12 }
 0x1d1   :  { %v4179_v53 = vmul.f32 %v1375_v0, %v1375_v0  ;;  %v4181_v34 = vmul.f32 %v1377_v23, %v1377_v23  ;;  %2260 = vmatmul.mubr.bf16.gmra.mrb[188].mxu1 %v1783_v36  ;;  %2549 = vmatmul.mubr.bf16.gmra.mrb[188].mxu0 %v1785_v38 }
 0x1d2   :  { %v4191_v52 = vmul.f32 %v1376_v50, %v1376_v50  ;;  %v4193_v29 = vmul.f32 %v1378_v48, %v1378_v48  ;;  %2267 = vmatprep.mubr.bf16.mxu1 %v1788_v44  ;;  %2556 = vmatprep.mubr.bf16.mxu0 %v4702_v5 }
 0x1d3   :  { %v1803_v56 = vpack.c.bf16 %v4179_v53, %v4173_v28 }
 0x1d4   :  { %v1804_v1 = vpack.c.bf16 %v4191_v52, %v4177_v43  ;;  %v1806_v2 = vpack.c.bf16 %v4193_v29, %v4189_v3  ;;  %v749_v36 = vpop.f32.mrb[84].mxu0  ;;  %v1102_v38 = vpop.f32.mrb[84].mxu1 }
 0x1d5   :  { %v1379_v33 = vmax.f32 %v749_v36, 0.0  ;;  %v1381_v18 = vmax.f32 %v1102_v38, 0.0  ;;  %v751_v44 = vpop.f32.mrb[85].mxu0  ;;  %v1104_v48 = vpop.f32.mrb[85].mxu1 }
 0x1d6   :  { %v1380_v13 = vmax.f32 %v751_v44, 0.0  ;;  %v1382_v30 = vmax.f32 %v1104_v48, 0.0  ;;  %v753_v32 = vpop.f32.mrb[86].mxu0  ;;  %v1106_v12 = vpop.f32.mrb[86].mxu1  ;;  %v4703_v44 = vpack.c.bf16 %v4035_v7, %v4029_v19  ;;  %v4704_v48 = vpack.c.bf16 %v4037_v6, %v4031_v42 }
 0x1d7   :  { %v1383_v35 = vmax.f32 %v753_v32, 0.0  ;;  %v1385_v22 = vmax.f32 %v1106_v12, 0.0  ;;  %v755_v0 = vpop.f32.mrb[87].mxu0  ;;  %v1108_v23 = vpop.f32.mrb[87].mxu1  ;;  %v4209_v46 = vmul.f32 %v1379_v33, %v1379_v33  ;;  %v4211_v14 = vmul.f32 %v1381_v18, %v1381_v18 }
 0x1d8   :  { %v1384_v50 = vmax.f32 %v755_v0, 0.0  ;;  %v1386_v5 = vmax.f32 %v1108_v23, 0.0  ;;  %v4213_v4 = vmul.f32 %v1380_v13, %v1380_v13  ;;  %v4225_v33 = vmul.f32 %v1382_v30, %v1382_v30 }
 0x1d9   :  { %v4215_v36 = vmul.f32 %v1383_v35, %v1383_v35  ;;  %v4217_v38 = vmul.f32 %v1385_v22, %v1385_v22  ;;  %2268 = vmatmul.mubr.bf16.gmra.mrb[192].mxu1 %v4703_v44  ;;  %2557 = vmatmul.mubr.bf16.gmra.mrb[192].mxu0 %v4704_v48 }
 0x1da   :  { %v4227_v18 = vmul.f32 %v1384_v50, %v1384_v50  ;;  %v4229_v32 = vmul.f32 %v1386_v5, %v1386_v5  ;;  %2275 = vmatprep.mubr.bf16.mxu1 %v1792_v10  ;;  %2564 = vmatprep.mubr.bf16.mxu0 %v1794_v11 }
 0x1dc   :  { %v1808_v7 = vpack.c.bf16 %v4227_v18, %v4213_v4  ;;  %v1810_v6 = vpack.c.bf16 %v4229_v32, %v4225_v33  ;;  %v759_v13 = vpop.f32.mrb[88].mxu0  ;;  %v1112_v30 = vpop.f32.mrb[88].mxu1 }
 0x1dd   :  { %v1387_v45 = vmax.f32 %v759_v13, 0.0  ;;  %v1389_v59 = vmax.f32 %v1112_v30, 0.0  ;;  %v761_v10 = vpop.f32.mrb[89].mxu0  ;;  %v1114_v12 = vpop.f32.mrb[89].mxu1 }
 0x1de   :  { %v1388_v26 = vmax.f32 %v761_v10, 0.0  ;;  %v1390_v49 = vmax.f32 %v1114_v12, 0.0  ;;  %v763_v11 = vpop.f32.mrb[90].mxu0  ;;  %v1116_v35 = vpop.f32.mrb[90].mxu1  ;;  %v4705_v10 = vpack.c.bf16 %v4071_v25, %v4065_v31  ;;  %v4706_v12 = vpack.c.bf16 %v4073_v15, %v4067_v55 }
 0x1df   :  { %v1391_v22 = vmax.f32 %v763_v11, 0.0  ;;  %v1393_v0 = vmax.f32 %v1116_v35, 0.0  ;;  %v765_v23 = vpop.f32.mrb[91].mxu0  ;;  %v1118_v50 = vpop.f32.mrb[91].mxu1  ;;  %v4245_v5 = vmul.f32 %v1387_v45, %v1387_v45  ;;  %v4247_v44 = vmul.f32 %v1389_v59, %v1389_v59 }
 0x1e0   :  { %v1392_v48 = vmax.f32 %v765_v23, 0.0  ;;  %v1394_v42 = vmax.f32 %v1118_v50, 0.0  ;;  %v4249_v19 = vmul.f32 %v1388_v26, %v1388_v26  ;;  %v4261_v45 = vmul.f32 %v1390_v49, %v1390_v49 }
 0x1e1   :  { %v4251_v13 = vmul.f32 %v1391_v22, %v1391_v22  ;;  %v4253_v30 = vmul.f32 %v1393_v0, %v1393_v0  ;;  %2276 = vmatmul.mubr.bf16.gmra.mrb[196].mxu1 %v4705_v10  ;;  %2565 = vmatmul.mubr.bf16.gmra.mrb[196].mxu0 %v4706_v12 }
 0x1e2   :  { %v4263_v59 = vmul.f32 %v1392_v48, %v1392_v48  ;;  %v4265_v11 = vmul.f32 %v1394_v42, %v1394_v42  ;;  %2283 = vmatprep.mubr.bf16.mxu1 %v1796_v41  ;;  %2572 = vmatprep.mubr.bf16.mxu0 %v1798_v8 }
 0x1e4   :  { %v1812_v25 = vpack.c.bf16 %v4263_v59, %v4249_v19  ;;  %v1814_v15 = vpack.c.bf16 %v4265_v11, %v4261_v45  ;;  %v769_v42 = vpop.f32.mrb[92].mxu0  ;;  %v1122_v26 = vpop.f32.mrb[92].mxu1 }
 0x1e5   :  { %v1395_v24 = vmax.f32 %v769_v42, 0.0  ;;  %v1397_v37 = vmax.f32 %v1122_v26, 0.0  ;;  %v771_v41 = vpop.f32.mrb[93].mxu0  ;;  %v1124_v49 = vpop.f32.mrb[93].mxu1 }
 0x1e6   :  { %v1396_v20 = vmax.f32 %v771_v41, 0.0  ;;  %v1398_v60 = vmax.f32 %v1124_v49, 0.0  ;;  %v773_v8 = vpop.f32.mrb[94].mxu0  ;;  %v1126_v35 = vpop.f32.mrb[94].mxu1  ;;  %v4707_v41 = vpack.c.bf16 %v4107_v27, %v4101_v54  ;;  %v4708_v49 = vpack.c.bf16 %v4109_v63, %v4103_v57 }
 0x1e7   :  { %v1399_v22 = vmax.f32 %v773_v8, 0.0  ;;  %v1401_v0 = vmax.f32 %v1126_v35, 0.0  ;;  %v775_v23 = vpop.f32.mrb[95].mxu0  ;;  %v1128_v50 = vpop.f32.mrb[95].mxu1  ;;  %v4281_v48 = vmul.f32 %v1395_v24, %v1395_v24  ;;  %v4283_v10 = vmul.f32 %v1397_v37, %v1397_v37 }
 0x1e8   :  { %v1400_v12 = vmax.f32 %v775_v23, 0.0  ;;  %v1402_v55 = vmax.f32 %v1128_v50, 0.0  ;;  %v4285_v31 = vmul.f32 %v1396_v20, %v1396_v20  ;;  %v4297_v24 = vmul.f32 %v1398_v60, %v1398_v60 }
 0x1e9   :  { %v4287_v42 = vmul.f32 %v1399_v22, %v1399_v22  ;;  %v4289_v26 = vmul.f32 %v1401_v0, %v1401_v0  ;;  %2284 = vmatmul.mubr.bf16.gmra.mrb[200].mxu1 %v4707_v41  ;;  %2573 = vmatmul.mubr.bf16.gmra.mrb[200].mxu0 %v4708_v49 }
 0x1ea   :  { %v4299_v37 = vmul.f32 %v1400_v12, %v1400_v12  ;;  %v4301_v8 = vmul.f32 %v1402_v55, %v1402_v55  ;;  %2291 = vmatprep.mubr.bf16.mxu1 %v1800_v51  ;;  %2580 = vmatprep.mubr.bf16.mxu0 %v1802_v21 }
 0x1ec   :  { %v1816_v27 = vpack.c.bf16 %v4299_v37, %v4285_v31  ;;  %v1818_v63 = vpack.c.bf16 %v4301_v8, %v4297_v24  ;;  %v779_v55 = vpop.f32.mrb[96].mxu0  ;;  %v1132_v20 = vpop.f32.mrb[96].mxu1 }
 0x1ed   :  { %v1403_v16 = vmax.f32 %v779_v55, 0.0  ;;  %v1405_v9 = vmax.f32 %v1132_v20, 0.0  ;;  %v781_v51 = vpop.f32.mrb[97].mxu0  ;;  %v1134_v60 = vpop.f32.mrb[97].mxu1 }
 0x1ee   :  { %v1404_v58 = vmax.f32 %v781_v51, 0.0  ;;  %v1406_v40 = vmax.f32 %v1134_v60, 0.0  ;;  %v783_v21 = vpop.f32.mrb[98].mxu0  ;;  %v1136_v35 = vpop.f32.mrb[98].mxu1  ;;  %v4709_v51 = vpack.c.bf16 %v4143_v17, %v4137_v62  ;;  %v4710_v60 = vpack.c.bf16 %v4145_v47, %v4139_v61 }
 0x1ef   :  { %v1407_v22 = vmax.f32 %v783_v21, 0.0  ;;  %v1409_v0 = vmax.f32 %v1136_v35, 0.0  ;;  %v785_v23 = vpop.f32.mrb[99].mxu0  ;;  %v1138_v50 = vpop.f32.mrb[99].mxu1  ;;  %v4317_v12 = vmul.f32 %v1403_v16, %v1403_v16  ;;  %v4319_v41 = vmul.f32 %v1405_v9, %v1405_v9 }
 0x1f0   :  { %v1408_v49 = vmax.f32 %v785_v23, 0.0  ;;  %v1410_v57 = vmax.f32 %v1138_v50, 0.0  ;;  %v4321_v54 = vmul.f32 %v1404_v58, %v1404_v58  ;;  %v4333_v16 = vmul.f32 %v1406_v40, %v1406_v40 }
 0x1f1   :  { %v4323_v55 = vmul.f32 %v1407_v22, %v1407_v22  ;;  %v4325_v20 = vmul.f32 %v1409_v0, %v1409_v0  ;;  %2292 = vmatmul.mubr.bf16.gmra.mrb[204].mxu1 %v4709_v51  ;;  %2581 = vmatmul.mubr.bf16.gmra.mrb[204].mxu0 %v4710_v60 }
 0x1f2   :  { %v4335_v9 = vmul.f32 %v1408_v49, %v1408_v49  ;;  %v4337_v21 = vmul.f32 %v1410_v57, %v1410_v57  ;;  %2299 = vmatprep.mubr.bf16.mxu1 %v1804_v1  ;;  %2588 = vmatprep.mubr.bf16.mxu0 %v1806_v2 }
 0x1f4   :  { %v1820_v17 = vpack.c.bf16 %v4335_v9, %v4321_v54  ;;  %v1822_v47 = vpack.c.bf16 %v4337_v21, %v4333_v16  ;;  %v789_v57 = vpop.f32.mrb[100].mxu0  ;;  %v1142_v58 = vpop.f32.mrb[100].mxu1 }
 0x1f5   :  { %v1411_v43 = vmax.f32 %v789_v57, 0.0  ;;  %v1413_v52 = vmax.f32 %v1142_v58, 0.0  ;;  %v791_v1 = vpop.f32.mrb[101].mxu0  ;;  %v1144_v40 = vpop.f32.mrb[101].mxu1 }
 0x1f6   :  { %v1412_v3 = vmax.f32 %v791_v1, 0.0  ;;  %v1414_v29 = vmax.f32 %v1144_v40, 0.0  ;;  %v793_v2 = vpop.f32.mrb[102].mxu0  ;;  %v1146_v35 = vpop.f32.mrb[102].mxu1  ;;  %v4711_v1 = vpack.c.bf16 %v4181_v34, %v4175_v39 }
 0x1f7   :  { %v1415_v22 = vmax.f32 %v793_v2, 0.0  ;;  %v1417_v0 = vmax.f32 %v1146_v35, 0.0  ;;  %v795_v23 = vpop.f32.mrb[103].mxu0  ;;  %v1148_v50 = vpop.f32.mrb[103].mxu1  ;;  %v4353_v49 = vmul.f32 %v1411_v43, %v1411_v43  ;;  %v4355_v51 = vmul.f32 %v1413_v52, %v1413_v52 }
 0x1f8   :  { %v1416_v60 = vmax.f32 %v795_v23, 0.0  ;;  %v1418_v61 = vmax.f32 %v1148_v50, 0.0  ;;  %v4357_v62 = vmul.f32 %v1412_v3, %v1412_v3  ;;  %v4369_v43 = vmul.f32 %v1414_v29, %v1414_v29 }
 0x1f9   :  { %v4359_v57 = vmul.f32 %v1415_v22, %v1415_v22  ;;  %v4361_v58 = vmul.f32 %v1417_v0, %v1417_v0  ;;  %2300 = vmatmul.mubr.bf16.gmra.mrb[208].mxu1 %v1803_v56  ;;  %2589 = vmatmul.mubr.bf16.gmra.mrb[208].mxu0 %v4711_v1 }
 0x1fa   :  { %v4371_v52 = vmul.f32 %v1416_v60, %v1416_v60  ;;  %v4373_v40 = vmul.f32 %v1418_v61, %v1418_v61  ;;  %2307 = vmatprep.mubr.bf16.mxu1 %v1808_v7  ;;  %2596 = vmatprep.mubr.bf16.mxu0 %v1810_v6 }
 0x1fb   :  { %v1823_v28 = vpack.c.bf16 %v4359_v57, %v4353_v49 }
 0x1fc   :  { %v1824_v53 = vpack.c.bf16 %v4371_v52, %v4357_v62  ;;  %v1826_v34 = vpack.c.bf16 %v4373_v40, %v4369_v43  ;;  %v799_v56 = vpop.f32.mrb[104].mxu0  ;;  %v1152_v61 = vpop.f32.mrb[104].mxu1 }
 0x1fd   :  { %v1419_v4 = vmax.f32 %v799_v56, 0.0  ;;  %v1421_v18 = vmax.f32 %v1152_v61, 0.0  ;;  %v801_v7 = vpop.f32.mrb[105].mxu0  ;;  %v1154_v3 = vpop.f32.mrb[105].mxu1 }
 0x1fe   :  { %v1420_v33 = vmax.f32 %v801_v7, 0.0  ;;  %v1422_v32 = vmax.f32 %v1154_v3, 0.0  ;;  %v803_v6 = vpop.f32.mrb[106].mxu0  ;;  %v1156_v29 = vpop.f32.mrb[106].mxu1  ;;  %v4712_v7 = vpack.c.bf16 %v4215_v36, %v4209_v46  ;;  %v4713_v3 = vpack.c.bf16 %v4217_v38, %v4211_v14 }
 0x1ff   :  { %v1423_v2 = vmax.f32 %v803_v6, 0.0  ;;  %v1425_v35 = vmax.f32 %v1156_v29, 0.0  ;;  %v805_v22 = vpop.f32.mrb[107].mxu0  ;;  %v1158_v0 = vpop.f32.mrb[107].mxu1  ;;  %v4389_v23 = vmul.f32 %v1419_v4, %v1419_v4  ;;  %v4391_v50 = vmul.f32 %v1421_v18, %v1421_v18 }
 0x200   :  { %v1424_v60 = vmax.f32 %v805_v22, 0.0  ;;  %v1426_v1 = vmax.f32 %v1158_v0, 0.0  ;;  %v4393_v39 = vmul.f32 %v1420_v33, %v1420_v33  ;;  %v4405_v4 = vmul.f32 %v1422_v32, %v1422_v32 }
 0x201   :  { %v4395_v56 = vmul.f32 %v1423_v2, %v1423_v2  ;;  %v4397_v61 = vmul.f32 %v1425_v35, %v1425_v35  ;;  %2308 = vmatmul.mubr.bf16.gmra.mrb[212].mxu1 %v4712_v7  ;;  %2597 = vmatmul.mubr.bf16.gmra.mrb[212].mxu0 %v4713_v3 }
 0x202   :  { %v4407_v18 = vmul.f32 %v1424_v60, %v1424_v60  ;;  %v4409_v6 = vmul.f32 %v1426_v1, %v1426_v1  ;;  %2315 = vmatprep.mubr.bf16.mxu1 %v1812_v25  ;;  %2604 = vmatprep.mubr.bf16.mxu0 %v1814_v15 }
 0x204   :  { %v1828_v36 = vpack.c.bf16 %v4407_v18, %v4393_v39  ;;  %v1830_v38 = vpack.c.bf16 %v4409_v6, %v4405_v4  ;;  %v809_v33 = vpop.f32.mrb[108].mxu0  ;;  %v1162_v32 = vpop.f32.mrb[108].mxu1 }
 0x205   :  { %v1427_v19 = vmax.f32 %v809_v33, 0.0  ;;  %v1429_v59 = vmax.f32 %v1162_v32, 0.0  ;;  %v811_v25 = vpop.f32.mrb[109].mxu0  ;;  %v1164_v29 = vpop.f32.mrb[109].mxu1 }
 0x206   :  { %v1428_v45 = vmax.f32 %v811_v25, 0.0  ;;  %v1430_v11 = vmax.f32 %v1164_v29, 0.0  ;;  %v813_v15 = vpop.f32.mrb[110].mxu0  ;;  %v1166_v2 = vpop.f32.mrb[110].mxu1  ;;  %v4714_v25 = vpack.c.bf16 %v4251_v13, %v4245_v5  ;;  %v4715_v29 = vpack.c.bf16 %v4253_v30, %v4247_v44 }
 0x207   :  { %v1431_v35 = vmax.f32 %v813_v15, 0.0  ;;  %v1433_v22 = vmax.f32 %v1166_v2, 0.0  ;;  %v815_v0 = vpop.f32.mrb[111].mxu0  ;;  %v1168_v60 = vpop.f32.mrb[111].mxu1  ;;  %v4425_v1 = vmul.f32 %v1427_v19, %v1427_v19  ;;  %v4427_v7 = vmul.f32 %v1429_v59, %v1429_v59 }
 0x208   :  { %v1432_v3 = vmax.f32 %v815_v0, 0.0  ;;  %v1434_v14 = vmax.f32 %v1168_v60, 0.0  ;;  %v4429_v46 = vmul.f32 %v1428_v45, %v1428_v45  ;;  %v4441_v19 = vmul.f32 %v1430_v11, %v1430_v11 }
 0x209   :  { %v4431_v33 = vmul.f32 %v1431_v35, %v1431_v35  ;;  %v4433_v32 = vmul.f32 %v1433_v22, %v1433_v22  ;;  %2316 = vmatmul.mubr.bf16.gmra.mrb[216].mxu1 %v4714_v25  ;;  %2605 = vmatmul.mubr.bf16.gmra.mrb[216].mxu0 %v4715_v29 }
 0x20a   :  { %v4443_v59 = vmul.f32 %v1432_v3, %v1432_v3  ;;  %v4445_v15 = vmul.f32 %v1434_v14, %v1434_v14  ;;  %2323 = vmatprep.mubr.bf16.mxu1 %v1816_v27  ;;  %2612 = vmatprep.mubr.bf16.mxu0 %v1818_v63 }
 0x20c   :  { %v1832_v13 = vpack.c.bf16 %v4443_v59, %v4429_v46  ;;  %v1834_v30 = vpack.c.bf16 %v4445_v15, %v4441_v19  ;;  %v819_v14 = vpop.f32.mrb[112].mxu0  ;;  %v1172_v45 = vpop.f32.mrb[112].mxu1 }
 0x20d   :  { %v1435_v31 = vmax.f32 %v819_v14, 0.0  ;;  %v1437_v37 = vmax.f32 %v1172_v45, 0.0  ;;  %v821_v27 = vpop.f32.mrb[113].mxu0  ;;  %v1174_v11 = vpop.f32.mrb[113].mxu1 }
 0x20e   :  { %v1436_v24 = vmax.f32 %v821_v27, 0.0  ;;  %v1438_v8 = vmax.f32 %v1174_v11, 0.0  ;;  %v823_v63 = vpop.f32.mrb[114].mxu0  ;;  %v1176_v2 = vpop.f32.mrb[114].mxu1  ;;  %v4716_v27 = vpack.c.bf16 %v4287_v42, %v4281_v48  ;;  %v4717_v11 = vpack.c.bf16 %v4289_v26, %v4283_v10 }
 0x20f   :  { %v1439_v35 = vmax.f32 %v823_v63, 0.0  ;;  %v1441_v22 = vmax.f32 %v1176_v2, 0.0  ;;  %v825_v0 = vpop.f32.mrb[115].mxu0  ;;  %v1178_v60 = vpop.f32.mrb[115].mxu1  ;;  %v4461_v3 = vmul.f32 %v1435_v31, %v1435_v31  ;;  %v4463_v25 = vmul.f32 %v1437_v37, %v1437_v37 }
 0x210   :  { %v1440_v29 = vmax.f32 %v825_v0, 0.0  ;;  %v1442_v44 = vmax.f32 %v1178_v60, 0.0  ;;  %v4465_v5 = vmul.f32 %v1436_v24, %v1436_v24  ;;  %v4477_v31 = vmul.f32 %v1438_v8, %v1438_v8 }
 0x211   :  { %v4467_v14 = vmul.f32 %v1439_v35, %v1439_v35  ;;  %v4469_v45 = vmul.f32 %v1441_v22, %v1441_v22  ;;  %2324 = vmatmul.mubr.bf16.gmra.mrb[220].mxu1 %v4716_v27  ;;  %2613 = vmatmul.mubr.bf16.gmra.mrb[220].mxu0 %v4717_v11 }
 0x212   :  { %v4479_v37 = vmul.f32 %v1440_v29, %v1440_v29  ;;  %v4481_v63 = vmul.f32 %v1442_v44, %v1442_v44  ;;  %2331 = vmatprep.mubr.bf16.mxu1 %v1820_v17  ;;  %2620 = vmatprep.mubr.bf16.mxu0 %v1822_v47 }
 0x214   :  { %v1836_v42 = vpack.c.bf16 %v4479_v37, %v4465_v5  ;;  %v1838_v26 = vpack.c.bf16 %v4481_v63, %v4477_v31  ;;  %v829_v44 = vpop.f32.mrb[116].mxu0  ;;  %v1182_v24 = vpop.f32.mrb[116].mxu1  ;;  %v4726_v5 = vpack.c.bf16 %v4469_v45, %v4463_v25 }
 0x215   :  { %v1443_v54 = vmax.f32 %v829_v44, 0.0  ;;  %v1445_v9 = vmax.f32 %v1182_v24, 0.0  ;;  %v831_v17 = vpop.f32.mrb[117].mxu0  ;;  %v1184_v8 = vpop.f32.mrb[117].mxu1 }
 0x216   :  { %v1444_v16 = vmax.f32 %v831_v17, 0.0  ;;  %v1446_v21 = vmax.f32 %v1184_v8, 0.0  ;;  %v833_v47 = vpop.f32.mrb[118].mxu0  ;;  %v1186_v2 = vpop.f32.mrb[118].mxu1  ;;  %v4718_v17 = vpack.c.bf16 %v4323_v55, %v4317_v12  ;;  %v4719_v8 = vpack.c.bf16 %v4325_v20, %v4319_v41 }
 0x217   :  { %v1447_v35 = vmax.f32 %v833_v47, 0.0  ;;  %v1449_v22 = vmax.f32 %v1186_v2, 0.0  ;;  %v835_v0 = vpop.f32.mrb[119].mxu0  ;;  %v1188_v60 = vpop.f32.mrb[119].mxu1  ;;  %v4497_v29 = vmul.f32 %v1443_v54, %v1443_v54  ;;  %v4499_v27 = vmul.f32 %v1445_v9, %v1445_v9 }
 0x218   :  { %v1448_v11 = vmax.f32 %v835_v0, 0.0  ;;  %v1450_v10 = vmax.f32 %v1188_v60, 0.0  ;;  %v4501_v48 = vmul.f32 %v1444_v16, %v1444_v16  ;;  %v4513_v54 = vmul.f32 %v1446_v21, %v1446_v21 }
 0x219   :  { %v4503_v44 = vmul.f32 %v1447_v35, %v1447_v35  ;;  %v4505_v24 = vmul.f32 %v1449_v22, %v1449_v22  ;;  %2332 = vmatmul.mubr.bf16.gmra.mrb[224].mxu1 %v4718_v17  ;;  %2621 = vmatmul.mubr.bf16.gmra.mrb[224].mxu0 %v4719_v8 }
 0x21a   :  { %v4515_v9 = vmul.f32 %v1448_v11, %v1448_v11  ;;  %v4517_v47 = vmul.f32 %v1450_v10, %v1450_v10  ;;  %2339 = vmatprep.mubr.bf16.mxu1 %v1824_v53  ;;  %2628 = vmatprep.mubr.bf16.mxu0 %v1826_v34 }
 0x21b   :  { %v4727_v45 = vpack.c.bf16 %v4503_v44, %v4497_v29 }
 0x21c   :  { %v1840_v55 = vpack.c.bf16 %v4515_v9, %v4501_v48  ;;  %v1842_v20 = vpack.c.bf16 %v4517_v47, %v4513_v54  ;;  %v839_v10 = vpop.f32.mrb[120].mxu0  ;;  %v1192_v16 = vpop.f32.mrb[120].mxu1  ;;  %v4728_v48 = vpack.c.bf16 %v4505_v24, %v4499_v27 }
 0x21d   :  { %v1451_v62 = vmax.f32 %v839_v10, 0.0  ;;  %v1453_v52 = vmax.f32 %v1192_v16, 0.0  ;;  %v841_v53 = vpop.f32.mrb[121].mxu0  ;;  %v1194_v21 = vpop.f32.mrb[121].mxu1 }
 0x21e   :  { %v1452_v43 = vmax.f32 %v841_v53, 0.0  ;;  %v1454_v40 = vmax.f32 %v1194_v21, 0.0  ;;  %v843_v34 = vpop.f32.mrb[122].mxu0  ;;  %v1196_v2 = vpop.f32.mrb[122].mxu1  ;;  %v4720_v53 = vpack.c.bf16 %v4361_v58, %v4355_v51 }
 0x21f   :  { %v1455_v35 = vmax.f32 %v843_v34, 0.0  ;;  %v1457_v22 = vmax.f32 %v1196_v2, 0.0  ;;  %v845_v0 = vpop.f32.mrb[123].mxu0  ;;  %v1198_v60 = vpop.f32.mrb[123].mxu1  ;;  %v4533_v11 = vmul.f32 %v1451_v62, %v1451_v62  ;;  %v4535_v17 = vmul.f32 %v1453_v52, %v1453_v52 }
 0x220   :  { %v1456_v8 = vmax.f32 %v845_v0, 0.0  ;;  %v1458_v41 = vmax.f32 %v1198_v60, 0.0  ;;  %v4537_v12 = vmul.f32 %v1452_v43, %v1452_v43  ;;  %v4549_v62 = vmul.f32 %v1454_v40, %v1454_v40 }
 0x221   :  { %v4539_v10 = vmul.f32 %v1455_v35, %v1455_v35  ;;  %v4541_v16 = vmul.f32 %v1457_v22, %v1457_v22  ;;  %2340 = vmatmul.mubr.bf16.gmra.mrb[228].mxu1 %v1823_v28  ;;  %2629 = vmatmul.mubr.bf16.gmra.mrb[228].mxu0 %v4720_v53 }
 0x222   :  { %v4551_v52 = vmul.f32 %v1456_v8, %v1456_v8  ;;  %v4553_v21 = vmul.f32 %v1458_v41, %v1458_v41  ;;  %2347 = vmatprep.mubr.bf16.mxu1 %v1828_v36  ;;  %2636 = vmatprep.mubr.bf16.mxu0 %v1830_v38 }
 0x223   :  { %v1843_v49 = vpack.c.bf16 %v4539_v10, %v4533_v11  ;;  %v4729_v24 = vpack.c.bf16 %v4541_v16, %v4535_v17 }
 0x224   :  { %v1844_v57 = vpack.c.bf16 %v4551_v52, %v4537_v12  ;;  %v1846_v58 = vpack.c.bf16 %v4553_v21, %v4549_v62  ;;  %v849_v28 = vpop.f32.mrb[124].mxu0  ;;  %v1202_v41 = vpop.f32.mrb[124].mxu1 }
 0x225   :  { %v1459_v39 = vmax.f32 %v849_v28, 0.0  ;;  %v1461_v18 = vmax.f32 %v1202_v41, 0.0  ;;  %v851_v36 = vpop.f32.mrb[125].mxu0  ;;  %v1204_v43 = vpop.f32.mrb[125].mxu1 }
 0x226   :  { %v1460_v4 = vmax.f32 %v851_v36, 0.0  ;;  %v1462_v6 = vmax.f32 %v1204_v43, 0.0  ;;  %v853_v38 = vpop.f32.mrb[126].mxu0  ;;  %v1206_v40 = vpop.f32.mrb[126].mxu1  ;;  %v4721_v36 = vpack.c.bf16 %v4395_v56, %v4389_v23  ;;  %v4722_v43 = vpack.c.bf16 %v4397_v61, %v4391_v50 }
 0x227   :  { %v1463_v34 = vmax.f32 %v853_v38, 0.0  ;;  %v1465_v2 = vmax.f32 %v1206_v40, 0.0  ;;  %v855_v35 = vpop.f32.mrb[127].mxu0  ;;  %v1208_v22 = vpop.f32.mrb[127].mxu1  ;;  %v4569_v0 = vmul.f32 %v1459_v39, %v1459_v39  ;;  %v4571_v60 = vmul.f32 %v1461_v18, %v1461_v18 }
 0x228   :  { %v1464_v8 = vmax.f32 %v855_v35, 0.0  ;;  %v1466_v53 = vmax.f32 %v1208_v22, 0.0  ;;  %v4573_v51 = vmul.f32 %v1460_v4, %v1460_v4  ;;  %v4585_v39 = vmul.f32 %v1462_v6, %v1462_v6 }
 0x229   :  { %v4575_v28 = vmul.f32 %v1463_v34, %v1463_v34  ;;  %v4577_v41 = vmul.f32 %v1465_v2, %v1465_v2  ;;  %2348 = vmatmul.mubr.bf16.gmra.mrb[232].mxu1 %v4721_v36  ;;  %2637 = vmatmul.mubr.bf16.gmra.mrb[232].mxu0 %v4722_v43  ;;  %v4723_v2 = vpack.c.bf16 %v4431_v33, %v4425_v1 }
 0x22a   :  { %v4587_v18 = vmul.f32 %v1464_v8, %v1464_v8  ;;  %v4589_v38 = vmul.f32 %v1466_v53, %v1466_v53  ;;  %2355 = vmatprep.mubr.bf16.mxu1 %v1832_v13  ;;  %2644 = vmatprep.mubr.bf16.mxu0 %v1834_v30  ;;  %v4724_v35 = vpack.c.bf16 %v4433_v32, %v4427_v7 }
 0x22b   :  { %v1847_v23 = vpack.c.bf16 %v4575_v28, %v4569_v0  ;;  %v1849_v50 = vpack.c.bf16 %v4577_v41, %v4571_v60  ;;  %v4725_v32 = vpack.c.bf16 %v4467_v14, %v4461_v3 }
 0x22c   :  { %v1848_v56 = vpack.c.bf16 %v4587_v18, %v4573_v51  ;;  %v1850_v61 = vpack.c.bf16 %v4589_v38, %v4585_v39  ;;  %v2141_v4 = vpop.f32.mrb[128].mxu1  ;;  %v2430_v6 = vpop.f32.mrb[128].mxu0 }
 0x22d   :  { %v2431_v46 = vadd.f32 %v2430_v6, %v2141_v4  ;;  %v2143_v59 = vpop.f32.mrb[129].mxu1  ;;  %v2432_v13 = vpop.f32.mrb[129].mxu0 }
 0x22e   :  { %v2144_v40 = vpop.f32.mrb[130].mxu1  ;;  %v2433_v19 = vpop.f32.mrb[130].mxu0 }
 0x22f   :  { %2689 = vst [vmem:[#allocation8] sm:$0xff] %v2431_v46  ;;  %v2434_v15 = vadd.f32 %v2433_v19, %v2144_v40  ;;  %v2146_v30 = vpop.f32.mrb[131].mxu1  ;;  %v2435_v34 = vpop.f32.mrb[131].mxu0 }
 0x231   :  { %2690 = vst [vmem:[#allocation8 + $0x8] sm:$0xff] %v2434_v15  ;;  %2356 = vmatmul.mubr.bf16.gmra.mrb[236].mxu1 %v4723_v2  ;;  %2645 = vmatmul.mubr.bf16.gmra.mrb[236].mxu0 %v4724_v35 }
 0x232   :  { %2363 = vmatprep.mubr.bf16.mxu1 %v1836_v42  ;;  %2652 = vmatprep.mubr.bf16.mxu0 %v1838_v26 }
 0x234   :  { %v2149_v22 = vpop.f32.mrb[132].mxu1  ;;  %v2438_v8 = vpop.f32.mrb[132].mxu0 }
 0x235   :  { %v2439_v53 = vadd.f32 %v2438_v8, %v2149_v22  ;;  %v2151_v36 = vpop.f32.mrb[133].mxu1  ;;  %v2440_v43 = vpop.f32.mrb[133].mxu0 }
 0x236   :  { %v2152_v4 = vpop.f32.mrb[134].mxu1  ;;  %v2441_v1 = vpop.f32.mrb[134].mxu0 }
 0x237   :  { %2691 = vst [vmem:[#allocation8 + $0x10] sm:$0xff] %v2439_v53  ;;  %v2442_v33 = vadd.f32 %v2441_v1, %v2152_v4  ;;  %v2154_v6 = vpop.f32.mrb[135].mxu1  ;;  %v2443_v7 = vpop.f32.mrb[135].mxu0 }
 0x239   :  { %2692 = vst [vmem:[#allocation8 + $0x18] sm:$0xff] %v2442_v33  ;;  %2364 = vmatmul.mubr.bf16.gmra.mrb[240].mxu1 %v4725_v32  ;;  %2653 = vmatmul.mubr.bf16.gmra.mrb[240].mxu0 %v4726_v5 }
 0x23a   :  { %2371 = vmatprep.mubr.bf16.mxu1 %v1840_v55  ;;  %2660 = vmatprep.mubr.bf16.mxu0 %v1842_v20 }
 0x23c   :  { %v2157_v31 = vpop.f32.mrb[136].mxu1  ;;  %v2446_v37 = vpop.f32.mrb[136].mxu0 }
 0x23d   :  { %v2447_v63 = vadd.f32 %v2446_v37, %v2157_v31  ;;  %v2159_v42 = vpop.f32.mrb[137].mxu1  ;;  %v2448_v26 = vpop.f32.mrb[137].mxu0 }
 0x23e   :  { %v2160_v46 = vpop.f32.mrb[138].mxu1  ;;  %v2449_v3 = vpop.f32.mrb[138].mxu0 }
 0x23f   :  { %2693 = vst [vmem:[#allocation8 + $0x20] sm:$0xff] %v2447_v63  ;;  %v2450_v14 = vadd.f32 %v2449_v3, %v2160_v46  ;;  %v2162_v59 = vpop.f32.mrb[139].mxu1  ;;  %v2451_v25 = vpop.f32.mrb[139].mxu0 }
 0x241   :  { %2694 = vst [vmem:[#allocation8 + $0x28] sm:$0xff] %v2450_v14  ;;  %2372 = vmatmul.mubr.bf16.gmra.mrb[244].mxu1 %v4727_v45  ;;  %2661 = vmatmul.mubr.bf16.gmra.mrb[244].mxu0 %v4728_v48 }
 0x242   :  { %2379 = vmatprep.mubr.bf16.mxu1 %v1844_v57  ;;  %2668 = vmatprep.mubr.bf16.mxu0 %v1846_v58 }
 0x244   :  { %v2165_v54 = vpop.f32.mrb[140].mxu1  ;;  %v2454_v9 = vpop.f32.mrb[140].mxu0 }
 0x245   :  { %v2455_v47 = vadd.f32 %v2454_v9, %v2165_v54  ;;  %v2167_v55 = vpop.f32.mrb[141].mxu1  ;;  %v2456_v20 = vpop.f32.mrb[141].mxu0 }
 0x246   :  { %v2168_v13 = vpop.f32.mrb[142].mxu1  ;;  %v2457_v29 = vpop.f32.mrb[142].mxu0 }
 0x247   :  { %2695 = vst [vmem:[#allocation8 + $0x30] sm:$0xff] %v2455_v47  ;;  %v2458_v44 = vadd.f32 %v2457_v29, %v2168_v13  ;;  %v2170_v40 = vpop.f32.mrb[143].mxu1  ;;  %v2459_v27 = vpop.f32.mrb[143].mxu0 }
 0x249   :  { %2696 = vst [vmem:[#allocation8 + $0x38] sm:$0xff] %v2458_v44  ;;  %2380 = vmatmul.mubr.bf16.gmra.mrb[248].mxu1 %v1843_v49  ;;  %2669 = vmatmul.mubr.bf16.gmra.mrb[248].mxu0 %v4729_v24 }
 0x24a   :  { %2387 = vmatprep.mubr.bf16.mxu1 %v1848_v56  ;;  %2676 = vmatprep.mubr.bf16.mxu0 %v1850_v61 }
 0x24c   :  { %v2173_v12 = vpop.f32.mrb[144].mxu1  ;;  %v2462_v62 = vpop.f32.mrb[144].mxu0 }
 0x24d   :  { %v2463_v52 = vadd.f32 %v2462_v62, %v2173_v12  ;;  %v2175_v21 = vpop.f32.mrb[145].mxu1  ;;  %v2464_v57 = vpop.f32.mrb[145].mxu0 }
 0x24e   :  { %v2176_v58 = vpop.f32.mrb[146].mxu1  ;;  %v2465_v11 = vpop.f32.mrb[146].mxu0 }
 0x24f   :  { %2697 = vst [vmem:[#allocation8 + $0x40] sm:$0xff] %v2463_v52  ;;  %v2466_v10 = vadd.f32 %v2465_v11, %v2176_v58  ;;  %v2178_v49 = vpop.f32.mrb[147].mxu1  ;;  %v2467_v17 = vpop.f32.mrb[147].mxu0 }
 0x251   :  { %2698 = vst [vmem:[#allocation8 + $0x48] sm:$0xff] %v2466_v10  ;;  %2388 = vmatmul.mubr.bf16.gmra.mrb[252].mxu1 %v1847_v23  ;;  %2677 = vmatmul.mubr.bf16.gmra.mrb[252].mxu0 %v1849_v50 }
 0x254   :  { %v2181_v16 = vpop.f32.mrb[148].mxu1  ;;  %v2470_v51 = vpop.f32.mrb[148].mxu0 }
 0x255   :  { %v2471_v39 = vadd.f32 %v2470_v51, %v2181_v16  ;;  %v2183_v18 = vpop.f32.mrb[149].mxu1  ;;  %v2472_v38 = vpop.f32.mrb[149].mxu0 }
 0x256   :  { %v2184_v56 = vpop.f32.mrb[150].mxu1  ;;  %v2473_v61 = vpop.f32.mrb[150].mxu0 }
 0x257   :  { %2699 = vst [vmem:[#allocation8 + $0x50] sm:$0xff] %v2471_v39  ;;  %v2474_v19 = vadd.f32 %v2473_v61, %v2184_v56  ;;  %v2186_v15 = vpop.f32.mrb[151].mxu1  ;;  %v2475_v30 = vpop.f32.mrb[151].mxu0 }
 0x259   :  { %2700 = vst [vmem:[#allocation8 + $0x58] sm:$0xff] %v2474_v19 }
 0x25c   :  { %v2189_v34 = vpop.f32.mrb[152].mxu1  ;;  %v2478_v2 = vpop.f32.mrb[152].mxu0 }
 0x25d   :  { %v2479_v0 = vadd.f32 %v2478_v2, %v2189_v34  ;;  %v2191_v28 = vpop.f32.mrb[153].mxu1  ;;  %v2480_v23 = vpop.f32.mrb[153].mxu0 }
 0x25e   :  { %v2192_v35 = vpop.f32.mrb[154].mxu1  ;;  %v2481_v60 = vpop.f32.mrb[154].mxu0 }
 0x25f   :  { %2701 = vst [vmem:[#allocation8 + $0x60] sm:$0xff] %v2479_v0  ;;  %v2482_v41 = vadd.f32 %v2481_v60, %v2192_v35  ;;  %v2194_v50 = vpop.f32.mrb[155].mxu1  ;;  %v2483_v22 = vpop.f32.mrb[155].mxu0 }
 0x261   :  { %2702 = vst [vmem:[#allocation8 + $0x68] sm:$0xff] %v2482_v41 }
 0x264   :  { %v2197_v8 = vpop.f32.mrb[156].mxu1  ;;  %v2486_v53 = vpop.f32.mrb[156].mxu0 }
 0x265   :  { %v2487_v36 = vadd.f32 %v2486_v53, %v2197_v8  ;;  %v2199_v43 = vpop.f32.mrb[157].mxu1  ;;  %v2488_v4 = vpop.f32.mrb[157].mxu0 }
 0x266   :  { %v2200_v1 = vpop.f32.mrb[158].mxu1  ;;  %v2489_v33 = vpop.f32.mrb[158].mxu0 }
 0x267   :  { %2703 = vst [vmem:[#allocation8 + $0x70] sm:$0xff] %v2487_v36  ;;  %v2490_v6 = vadd.f32 %v2489_v33, %v2200_v1  ;;  %v2202_v7 = vpop.f32.mrb[159].mxu1  ;;  %v2491_v32 = vpop.f32.mrb[159].mxu0 }
 0x269   :  { %2704 = vst [vmem:[#allocation8 + $0x78] sm:$0xff] %v2490_v6 }
 0x26c   :  { %v2205_v5 = vpop.f32.mrb[160].mxu1  ;;  %v2494_v31 = vpop.f32.mrb[160].mxu0 }
 0x26d   :  { %v2495_v37 = vadd.f32 %v2494_v31, %v2205_v5  ;;  %v2207_v63 = vpop.f32.mrb[161].mxu1  ;;  %v2496_v42 = vpop.f32.mrb[161].mxu0 }
 0x26e   :  { %v2208_v26 = vpop.f32.mrb[162].mxu1  ;;  %v2497_v46 = vpop.f32.mrb[162].mxu0 }
 0x26f   :  { %2705 = vst [vmem:[#allocation8 + $0x80] sm:$0xff] %v2495_v37  ;;  %v2498_v3 = vadd.f32 %v2497_v46, %v2208_v26  ;;  %v2210_v14 = vpop.f32.mrb[163].mxu1  ;;  %v2499_v59 = vpop.f32.mrb[163].mxu0 }
 0x271   :  { %2706 = vst [vmem:[#allocation8 + $0x88] sm:$0xff] %v2498_v3 }
 0x274   :  { %v2213_v25 = vpop.f32.mrb[164].mxu1  ;;  %v2502_v45 = vpop.f32.mrb[164].mxu0 }
 0x275   :  { %v2503_v48 = vadd.f32 %v2502_v45, %v2213_v25  ;;  %v2215_v54 = vpop.f32.mrb[165].mxu1  ;;  %v2504_v9 = vpop.f32.mrb[165].mxu0 }
 0x276   :  { %v2216_v47 = vpop.f32.mrb[166].mxu1  ;;  %v2505_v55 = vpop.f32.mrb[166].mxu0 }
 0x277   :  { %2707 = vst [vmem:[#allocation8 + $0x90] sm:$0xff] %v2503_v48  ;;  %v2506_v20 = vadd.f32 %v2505_v55, %v2216_v47  ;;  %v2218_v13 = vpop.f32.mrb[167].mxu1  ;;  %v2507_v29 = vpop.f32.mrb[167].mxu0 }
 0x279   :  { %2708 = vst [vmem:[#allocation8 + $0x98] sm:$0xff] %v2506_v20 }
 0x27c   :  { %v2221_v44 = vpop.f32.mrb[168].mxu1  ;;  %v2510_v40 = vpop.f32.mrb[168].mxu0 }
 0x27d   :  { %v2511_v27 = vadd.f32 %v2510_v40, %v2221_v44  ;;  %v2223_v24 = vpop.f32.mrb[169].mxu1  ;;  %v2512_v12 = vpop.f32.mrb[169].mxu0 }
 0x27e   :  { %v2224_v62 = vpop.f32.mrb[170].mxu1  ;;  %v2513_v52 = vpop.f32.mrb[170].mxu0 }
 0x27f   :  { %2709 = vst [vmem:[#allocation8 + $0xa0] sm:$0xff] %v2511_v27  ;;  %v2514_v21 = vadd.f32 %v2513_v52, %v2224_v62  ;;  %v2226_v57 = vpop.f32.mrb[171].mxu1  ;;  %v2515_v58 = vpop.f32.mrb[171].mxu0 }
 0x281   :  { %2710 = vst [vmem:[#allocation8 + $0xa8] sm:$0xff] %v2514_v21 }
 0x284   :  { %v2229_v11 = vpop.f32.mrb[172].mxu1  ;;  %v2518_v10 = vpop.f32.mrb[172].mxu0 }
 0x285   :  { %v2519_v49 = vadd.f32 %v2518_v10, %v2229_v11  ;;  %v2231_v17 = vpop.f32.mrb[173].mxu1  ;;  %v2520_v16 = vpop.f32.mrb[173].mxu0 }
 0x286   :  { %v2232_v51 = vpop.f32.mrb[174].mxu1  ;;  %v2521_v39 = vpop.f32.mrb[174].mxu0 }
 0x287   :  { %2711 = vst [vmem:[#allocation8 + $0xb0] sm:$0xff] %v2519_v49  ;;  %v2522_v18 = vadd.f32 %v2521_v39, %v2232_v51  ;;  %v2234_v38 = vpop.f32.mrb[175].mxu1  ;;  %v2523_v56 = vpop.f32.mrb[175].mxu0 }
 0x289   :  { %2712 = vst [vmem:[#allocation8 + $0xb8] sm:$0xff] %v2522_v18 }
 0x28c   :  { %v2237_v61 = vpop.f32.mrb[176].mxu1  ;;  %v2526_v19 = vpop.f32.mrb[176].mxu0 }
 0x28d   :  { %v2527_v15 = vadd.f32 %v2526_v19, %v2237_v61  ;;  %v2239_v30 = vpop.f32.mrb[177].mxu1  ;;  %v2528_v34 = vpop.f32.mrb[177].mxu0 }
 0x28e   :  { %v2240_v2 = vpop.f32.mrb[178].mxu1  ;;  %v2529_v0 = vpop.f32.mrb[178].mxu0 }
 0x28f   :  { %2713 = vst [vmem:[#allocation8 + $0xc0] sm:$0xff] %v2527_v15  ;;  %v2530_v28 = vadd.f32 %v2529_v0, %v2240_v2  ;;  %v2242_v23 = vpop.f32.mrb[179].mxu1  ;;  %v2531_v35 = vpop.f32.mrb[179].mxu0 }
 0x291   :  { %2714 = vst [vmem:[#allocation8 + $0xc8] sm:$0xff] %v2530_v28 }
 0x294   :  { %v2245_v60 = vpop.f32.mrb[180].mxu1  ;;  %v2534_v41 = vpop.f32.mrb[180].mxu0 }
 0x295   :  { %v2535_v50 = vadd.f32 %v2534_v41, %v2245_v60  ;;  %v2247_v22 = vpop.f32.mrb[181].mxu1  ;;  %v2536_v8 = vpop.f32.mrb[181].mxu0 }
 0x296   :  { %v2248_v53 = vpop.f32.mrb[182].mxu1  ;;  %v2537_v36 = vpop.f32.mrb[182].mxu0 }
 0x297   :  { %2715 = vst [vmem:[#allocation8 + $0xd0] sm:$0xff] %v2535_v50  ;;  %v2538_v43 = vadd.f32 %v2537_v36, %v2248_v53  ;;  %v2250_v4 = vpop.f32.mrb[183].mxu1  ;;  %v2539_v1 = vpop.f32.mrb[183].mxu0 }
 0x299   :  { %2716 = vst [vmem:[#allocation8 + $0xd8] sm:$0xff] %v2538_v43 }
 0x29c   :  { %v2253_v33 = vpop.f32.mrb[184].mxu1  ;;  %v2542_v6 = vpop.f32.mrb[184].mxu0 }
 0x29d   :  { %v2543_v7 = vadd.f32 %v2542_v6, %v2253_v33  ;;  %v2255_v32 = vpop.f32.mrb[185].mxu1  ;;  %v2544_v5 = vpop.f32.mrb[185].mxu0 }
 0x29e   :  { %v2256_v31 = vpop.f32.mrb[186].mxu1  ;;  %v2545_v37 = vpop.f32.mrb[186].mxu0 }
 0x29f   :  { %2717 = vst [vmem:[#allocation8 + $0xe0] sm:$0xff] %v2543_v7  ;;  %v2546_v63 = vadd.f32 %v2545_v37, %v2256_v31  ;;  %v2258_v42 = vpop.f32.mrb[187].mxu1  ;;  %v2547_v26 = vpop.f32.mrb[187].mxu0 }
 0x2a1   :  { %2718 = vst [vmem:[#allocation8 + $0xe8] sm:$0xff] %v2546_v63 }
 0x2a4   :  { %v2261_v46 = vpop.f32.mrb[188].mxu1  ;;  %v2550_v3 = vpop.f32.mrb[188].mxu0 }
 0x2a5   :  { %v2551_v14 = vadd.f32 %v2550_v3, %v2261_v46  ;;  %v2263_v59 = vpop.f32.mrb[189].mxu1  ;;  %v2552_v25 = vpop.f32.mrb[189].mxu0 }
 0x2a6   :  { %v2264_v45 = vpop.f32.mrb[190].mxu1  ;;  %v2553_v48 = vpop.f32.mrb[190].mxu0 }
 0x2a7   :  { %2719 = vst [vmem:[#allocation8 + $0xf0] sm:$0xff] %v2551_v14  ;;  %v2554_v54 = vadd.f32 %v2553_v48, %v2264_v45  ;;  %v2266_v9 = vpop.f32.mrb[191].mxu1  ;;  %v2555_v47 = vpop.f32.mrb[191].mxu0 }
 0x2a9   :  { %2720 = vst [vmem:[#allocation8 + $0xf8] sm:$0xff] %v2554_v54 }
 0x2ac   :  { %v2269_v55 = vpop.f32.mrb[192].mxu1  ;;  %v2558_v20 = vpop.f32.mrb[192].mxu0 }
 0x2ad   :  { %v2559_v13 = vadd.f32 %v2558_v20, %v2269_v55  ;;  %v2271_v29 = vpop.f32.mrb[193].mxu1  ;;  %v2560_v44 = vpop.f32.mrb[193].mxu0 }
 0x2ae   :  { %v2272_v40 = vpop.f32.mrb[194].mxu1  ;;  %v2561_v27 = vpop.f32.mrb[194].mxu0 }
 0x2af   :  { %2721 = vst [vmem:[#allocation8 + $0x100] sm:$0xff] %v2559_v13  ;;  %v2562_v24 = vadd.f32 %v2561_v27, %v2272_v40  ;;  %v2274_v12 = vpop.f32.mrb[195].mxu1  ;;  %v2563_v62 = vpop.f32.mrb[195].mxu0 }
 0x2b1   :  { %2722 = vst [vmem:[#allocation8 + $0x108] sm:$0xff] %v2562_v24 }
 0x2b4   :  { %v2277_v52 = vpop.f32.mrb[196].mxu1  ;;  %v2566_v21 = vpop.f32.mrb[196].mxu0 }
 0x2b5   :  { %v2567_v57 = vadd.f32 %v2566_v21, %v2277_v52  ;;  %v2279_v58 = vpop.f32.mrb[197].mxu1  ;;  %v2568_v11 = vpop.f32.mrb[197].mxu0 }
 0x2b6   :  { %v2280_v10 = vpop.f32.mrb[198].mxu1  ;;  %v2569_v49 = vpop.f32.mrb[198].mxu0 }
 0x2b7   :  { %2723 = vst [vmem:[#allocation8 + $0x110] sm:$0xff] %v2567_v57  ;;  %v2570_v17 = vadd.f32 %v2569_v49, %v2280_v10  ;;  %v2282_v16 = vpop.f32.mrb[199].mxu1  ;;  %v2571_v51 = vpop.f32.mrb[199].mxu0 }
 0x2b9   :  { %2724 = vst [vmem:[#allocation8 + $0x118] sm:$0xff] %v2570_v17 }
 0x2bc   :  { %v2285_v39 = vpop.f32.mrb[200].mxu1  ;;  %v2574_v18 = vpop.f32.mrb[200].mxu0 }
 0x2bd   :  { %v2575_v38 = vadd.f32 %v2574_v18, %v2285_v39  ;;  %v2287_v56 = vpop.f32.mrb[201].mxu1  ;;  %v2576_v61 = vpop.f32.mrb[201].mxu0 }
 0x2be   :  { %v2288_v19 = vpop.f32.mrb[202].mxu1  ;;  %v2577_v15 = vpop.f32.mrb[202].mxu0 }
 0x2bf   :  { %2725 = vst [vmem:[#allocation8 + $0x120] sm:$0xff] %v2575_v38  ;;  %v2578_v30 = vadd.f32 %v2577_v15, %v2288_v19  ;;  %v2290_v34 = vpop.f32.mrb[203].mxu1  ;;  %v2579_v2 = vpop.f32.mrb[203].mxu0 }
 0x2c1   :  { %2726 = vst [vmem:[#allocation8 + $0x128] sm:$0xff] %v2578_v30 }
 0x2c4   :  { %v2293_v0 = vpop.f32.mrb[204].mxu1  ;;  %v2582_v28 = vpop.f32.mrb[204].mxu0 }
 0x2c5   :  { %v2583_v23 = vadd.f32 %v2582_v28, %v2293_v0  ;;  %v2295_v35 = vpop.f32.mrb[205].mxu1  ;;  %v2584_v60 = vpop.f32.mrb[205].mxu0 }
 0x2c6   :  { %v2296_v41 = vpop.f32.mrb[206].mxu1  ;;  %v2585_v50 = vpop.f32.mrb[206].mxu0 }
 0x2c7   :  { %2727 = vst [vmem:[#allocation8 + $0x130] sm:$0xff] %v2583_v23  ;;  %v2586_v22 = vadd.f32 %v2585_v50, %v2296_v41  ;;  %v2298_v8 = vpop.f32.mrb[207].mxu1  ;;  %v2587_v53 = vpop.f32.mrb[207].mxu0 }
 0x2c9   :  { %2728 = vst [vmem:[#allocation8 + $0x138] sm:$0xff] %v2586_v22 }
 0x2cc   :  { %v2301_v36 = vpop.f32.mrb[208].mxu1  ;;  %v2590_v43 = vpop.f32.mrb[208].mxu0 }
 0x2cd   :  { %v2591_v4 = vadd.f32 %v2590_v43, %v2301_v36  ;;  %v2303_v1 = vpop.f32.mrb[209].mxu1  ;;  %v2592_v33 = vpop.f32.mrb[209].mxu0 }
 0x2ce   :  { %v2304_v6 = vpop.f32.mrb[210].mxu1  ;;  %v2593_v7 = vpop.f32.mrb[210].mxu0 }
 0x2cf   :  { %2729 = vst [vmem:[#allocation8 + $0x140] sm:$0xff] %v2591_v4  ;;  %v2594_v32 = vadd.f32 %v2593_v7, %v2304_v6  ;;  %v2306_v5 = vpop.f32.mrb[211].mxu1  ;;  %v2595_v31 = vpop.f32.mrb[211].mxu0 }
 0x2d1   :  { %2730 = vst [vmem:[#allocation8 + $0x148] sm:$0xff] %v2594_v32 }
 0x2d4   :  { %v2309_v37 = vpop.f32.mrb[212].mxu1  ;;  %v2598_v63 = vpop.f32.mrb[212].mxu0 }
 0x2d5   :  { %v2599_v42 = vadd.f32 %v2598_v63, %v2309_v37  ;;  %v2311_v26 = vpop.f32.mrb[213].mxu1  ;;  %v2600_v46 = vpop.f32.mrb[213].mxu0 }
 0x2d6   :  { %v2312_v3 = vpop.f32.mrb[214].mxu1  ;;  %v2601_v14 = vpop.f32.mrb[214].mxu0 }
 0x2d7   :  { %2731 = vst [vmem:[#allocation8 + $0x150] sm:$0xff] %v2599_v42  ;;  %v2602_v59 = vadd.f32 %v2601_v14, %v2312_v3  ;;  %v2314_v25 = vpop.f32.mrb[215].mxu1  ;;  %v2603_v45 = vpop.f32.mrb[215].mxu0 }
 0x2d9   :  { %2732 = vst [vmem:[#allocation8 + $0x158] sm:$0xff] %v2602_v59 }
 0x2dc   :  { %v2317_v48 = vpop.f32.mrb[216].mxu1  ;;  %v2606_v54 = vpop.f32.mrb[216].mxu0 }
 0x2dd   :  { %v2607_v9 = vadd.f32 %v2606_v54, %v2317_v48  ;;  %v2319_v47 = vpop.f32.mrb[217].mxu1  ;;  %v2608_v55 = vpop.f32.mrb[217].mxu0 }
 0x2de   :  { %v2320_v20 = vpop.f32.mrb[218].mxu1  ;;  %v2609_v13 = vpop.f32.mrb[218].mxu0 }
 0x2df   :  { %2733 = vst [vmem:[#allocation8 + $0x160] sm:$0xff] %v2607_v9  ;;  %v2610_v29 = vadd.f32 %v2609_v13, %v2320_v20  ;;  %v2322_v44 = vpop.f32.mrb[219].mxu1  ;;  %v2611_v40 = vpop.f32.mrb[219].mxu0 }
 0x2e1   :  { %2734 = vst [vmem:[#allocation8 + $0x168] sm:$0xff] %v2610_v29 }
 0x2e4   :  { %v2325_v27 = vpop.f32.mrb[220].mxu1  ;;  %v2614_v24 = vpop.f32.mrb[220].mxu0 }
 0x2e5   :  { %v2615_v12 = vadd.f32 %v2614_v24, %v2325_v27  ;;  %v2327_v62 = vpop.f32.mrb[221].mxu1  ;;  %v2616_v52 = vpop.f32.mrb[221].mxu0 }
 0x2e6   :  { %v2328_v21 = vpop.f32.mrb[222].mxu1  ;;  %v2617_v57 = vpop.f32.mrb[222].mxu0 }
 0x2e7   :  { %2735 = vst [vmem:[#allocation8 + $0x170] sm:$0xff] %v2615_v12  ;;  %v2618_v58 = vadd.f32 %v2617_v57, %v2328_v21  ;;  %v2330_v11 = vpop.f32.mrb[223].mxu1  ;;  %v2619_v10 = vpop.f32.mrb[223].mxu0 }
 0x2e9   :  { %2736 = vst [vmem:[#allocation8 + $0x178] sm:$0xff] %v2618_v58 }
 0x2ec   :  { %v2333_v49 = vpop.f32.mrb[224].mxu1  ;;  %v2622_v17 = vpop.f32.mrb[224].mxu0 }
 0x2ed   :  { %v2623_v16 = vadd.f32 %v2622_v17, %v2333_v49  ;;  %v2335_v51 = vpop.f32.mrb[225].mxu1  ;;  %v2624_v39 = vpop.f32.mrb[225].mxu0 }
 0x2ee   :  { %v2336_v18 = vpop.f32.mrb[226].mxu1  ;;  %v2625_v38 = vpop.f32.mrb[226].mxu0 }
 0x2ef   :  { %2737 = vst [vmem:[#allocation8 + $0x180] sm:$0xff] %v2623_v16  ;;  %v2626_v56 = vadd.f32 %v2625_v38, %v2336_v18  ;;  %v2338_v61 = vpop.f32.mrb[227].mxu1  ;;  %v2627_v19 = vpop.f32.mrb[227].mxu0 }
 0x2f1   :  { %2738 = vst [vmem:[#allocation8 + $0x188] sm:$0xff] %v2626_v56 }
 0x2f4   :  { %v2341_v15 = vpop.f32.mrb[228].mxu1  ;;  %v2630_v30 = vpop.f32.mrb[228].mxu0 }
 0x2f5   :  { %v2631_v34 = vadd.f32 %v2630_v30, %v2341_v15  ;;  %v2343_v2 = vpop.f32.mrb[229].mxu1  ;;  %v2632_v0 = vpop.f32.mrb[229].mxu0 }
 0x2f6   :  { %v2344_v28 = vpop.f32.mrb[230].mxu1  ;;  %v2633_v23 = vpop.f32.mrb[230].mxu0 }
 0x2f7   :  { %2739 = vst [vmem:[#allocation8 + $0x190] sm:$0xff] %v2631_v34  ;;  %v2634_v35 = vadd.f32 %v2633_v23, %v2344_v28  ;;  %v2346_v60 = vpop.f32.mrb[231].mxu1  ;;  %v2635_v41 = vpop.f32.mrb[231].mxu0 }
 0x2f9   :  { %2740 = vst [vmem:[#allocation8 + $0x198] sm:$0xff] %v2634_v35 }
 0x2fc   :  { %v2349_v50 = vpop.f32.mrb[232].mxu1  ;;  %v2638_v22 = vpop.f32.mrb[232].mxu0 }
 0x2fd   :  { %v2639_v8 = vadd.f32 %v2638_v22, %v2349_v50  ;;  %v2351_v53 = vpop.f32.mrb[233].mxu1  ;;  %v2640_v36 = vpop.f32.mrb[233].mxu0 }
 0x2fe   :  { %v2352_v43 = vpop.f32.mrb[234].mxu1  ;;  %v2641_v4 = vpop.f32.mrb[234].mxu0 }
 0x2ff   :  { %2741 = vst [vmem:[#allocation8 + $0x1a0] sm:$0xff] %v2639_v8  ;;  %v2642_v1 = vadd.f32 %v2641_v4, %v2352_v43  ;;  %v2354_v33 = vpop.f32.mrb[235].mxu1  ;;  %v2643_v6 = vpop.f32.mrb[235].mxu0 }
 0x301   :  { %2742 = vst [vmem:[#allocation8 + $0x1a8] sm:$0xff] %v2642_v1 }
 0x304   :  { %v2357_v7 = vpop.f32.mrb[236].mxu1  ;;  %v2646_v32 = vpop.f32.mrb[236].mxu0 }
 0x305   :  { %v2647_v5 = vadd.f32 %v2646_v32, %v2357_v7  ;;  %v2359_v31 = vpop.f32.mrb[237].mxu1  ;;  %v2648_v37 = vpop.f32.mrb[237].mxu0 }
 0x306   :  { %v2360_v63 = vpop.f32.mrb[238].mxu1  ;;  %v2649_v42 = vpop.f32.mrb[238].mxu0 }
 0x307   :  { %2743 = vst [vmem:[#allocation8 + $0x1b0] sm:$0xff] %v2647_v5  ;;  %v2650_v26 = vadd.f32 %v2649_v42, %v2360_v63  ;;  %v2362_v46 = vpop.f32.mrb[239].mxu1  ;;  %v2651_v3 = vpop.f32.mrb[239].mxu0 }
 0x309   :  { %2744 = vst [vmem:[#allocation8 + $0x1b8] sm:$0xff] %v2650_v26 }
 0x30c   :  { %v2365_v14 = vpop.f32.mrb[240].mxu1  ;;  %v2654_v59 = vpop.f32.mrb[240].mxu0 }
 0x30d   :  { %v2655_v25 = vadd.f32 %v2654_v59, %v2365_v14  ;;  %v2367_v45 = vpop.f32.mrb[241].mxu1  ;;  %v2656_v48 = vpop.f32.mrb[241].mxu0 }
 0x30e   :  { %v2368_v54 = vpop.f32.mrb[242].mxu1  ;;  %v2657_v9 = vpop.f32.mrb[242].mxu0 }
 0x30f   :  { %2745 = vst [vmem:[#allocation8 + $0x1c0] sm:$0xff] %v2655_v25  ;;  %v2658_v47 = vadd.f32 %v2657_v9, %v2368_v54  ;;  %v2370_v55 = vpop.f32.mrb[243].mxu1  ;;  %v2659_v20 = vpop.f32.mrb[243].mxu0 }
 0x311   :  { %2746 = vst [vmem:[#allocation8 + $0x1c8] sm:$0xff] %v2658_v47 }
 0x314   :  { %v2373_v13 = vpop.f32.mrb[244].mxu1  ;;  %v2662_v29 = vpop.f32.mrb[244].mxu0 }
 0x315   :  { %v2663_v44 = vadd.f32 %v2662_v29, %v2373_v13  ;;  %v2375_v40 = vpop.f32.mrb[245].mxu1  ;;  %v2664_v27 = vpop.f32.mrb[245].mxu0 }
 0x316   :  { %v2376_v24 = vpop.f32.mrb[246].mxu1  ;;  %v2665_v12 = vpop.f32.mrb[246].mxu0 }
 0x317   :  { %2747 = vst [vmem:[#allocation8 + $0x1d0] sm:$0xff] %v2663_v44  ;;  %v2666_v62 = vadd.f32 %v2665_v12, %v2376_v24  ;;  %v2378_v52 = vpop.f32.mrb[247].mxu1  ;;  %v2667_v21 = vpop.f32.mrb[247].mxu0 }
 0x319   :  { %2748 = vst [vmem:[#allocation8 + $0x1d8] sm:$0xff] %v2666_v62 }
 0x31c   :  { %v2381_v57 = vpop.f32.mrb[248].mxu1  ;;  %v2670_v58 = vpop.f32.mrb[248].mxu0 }
 0x31d   :  { %v2671_v11 = vadd.f32 %v2670_v58, %v2381_v57  ;;  %v2383_v10 = vpop.f32.mrb[249].mxu1  ;;  %v2672_v49 = vpop.f32.mrb[249].mxu0 }
 0x31e   :  { %v2384_v17 = vpop.f32.mrb[250].mxu1  ;;  %v2673_v16 = vpop.f32.mrb[250].mxu0 }
 0x31f   :  { %2749 = vst [vmem:[#allocation8 + $0x1e0] sm:$0xff] %v2671_v11  ;;  %v2674_v51 = vadd.f32 %v2673_v16, %v2384_v17  ;;  %v2386_v39 = vpop.f32.mrb[251].mxu1  ;;  %v2675_v18 = vpop.f32.mrb[251].mxu0 }
 0x321   :  { %2750 = vst [vmem:[#allocation8 + $0x1e8] sm:$0xff] %v2674_v51 }
 0x324   :  { %v2389_v38 = vpop.f32.mrb[252].mxu1  ;;  %v2678_v56 = vpop.f32.mrb[252].mxu0 }
 0x325   :  { %v2679_v61 = vadd.f32 %v2678_v56, %v2389_v38  ;;  %v2391_v19 = vpop.f32.mrb[253].mxu1  ;;  %v2680_v15 = vpop.f32.mrb[253].mxu0 }
 0x326   :  { %v2392_v30 = vpop.f32.mrb[254].mxu1  ;;  %v2681_v34 = vpop.f32.mrb[254].mxu0 }
 0x327   :  { %2751 = vst [vmem:[#allocation8 + $0x1f0] sm:$0xff] %v2679_v61  ;;  %v2682_v2 = vadd.f32 %v2681_v34, %v2392_v30  ;;  %v2394_v0 = vpop.f32.mrb[255].mxu1  ;;  %v2683_v28 = vpop.f32.mrb[255].mxu0 }
 0x329   :  { %2752 = vst [vmem:[#allocation8 + $0x1f8] sm:$0xff] %v2682_v2 }
 0x32a   :  { %3327 = shalt.err (!%p3324_p0)
}
 0x32b   :  { %s3328_s27 = scalar_lea.hbm %s4674_s3, 8192 }
 0x32c   :  { %p3329_p1 = scmp.ne.s32.totalorder %s4674_s3, %s3328_s27  ;;  %p3332_p2 = scmp.lt.u32.totalorder %s3328_s27, %s4674_s3 }
 0x32e   :  { %p3334_p3 = pnand %p3332_p2, %p3329_p1 }
 0x330   :  { %3337 = shalt.err (!%p3334_p3)
}
 0x331   :  { %s3353_s5 = smov 128   ;;  %s3354_s6 = smov 8  }
 0x332   :  { %2960 = dma.vmem_to_hbm [thread:$0]  %s2955_s23, 8192, %s4674_s3, [#allocation4], %s3353_s5, %s3353_s5, %s3354_s6  }
 0x333   :  { %3342 = dma.done.wait [#allocation4], 8192  }
 0x334   :  { %3343 = vsyncadd [#allocation4], 4294959104 }
 0x335   :  { %2964 = vsyncpa [#allocation3], 1 }
 0x336   :  { %2965 = vsyncpa [#allocation6], 1 }
 0x337   :  { %2966 = vsyncpa [#allocation4], 1 }

</bundles_post_ra>
